<compile_context>
chip_gen: v7x
topology: tpu7x:2x2x1
jax: 0.10.0
libtpu: 0.0.40
codegen_flags: <defaults>
</compile_context>

<pallas_src>
import functools

import jax
import jax.numpy as jnp
from jax import lax
from jax.experimental import pallas as pl
from jax.experimental.pallas import tpu as pltpu

EPS = 1e-5
CPAD = 128          # lane-dense channel padding
KPAD = 32           # conv1 im2col contraction depth (9 taps * 3 ch = 27 -> 32)


@functools.lru_cache(maxsize=None)
def _vmem_limit_bytes():
    """3/4 of physical VMEM, capped at 96 MiB (large on v5e/v6e, safe on v7x)."""
    try:
        cap = int(pltpu.get_tpu_info().vmem_capacity_bytes)
    except Exception:
        cap = 64 * 1024 * 1024
    return int(min(max(cap * 3 // 4, 32 * 1024 * 1024), 96 * 1024 * 1024))


# ------- kernel 1: conv1 + BN + ReLU + maxpool + conv5 + BN + ReLU + mean -------

def _features_kernel(xs_ref, w1_ref, b1_ref, w5_ref, b5_ref, o_ref,
                     *, ho, wo, hp, wp):
    """Per-image fused forward_features (minus the skipped stages).

    xs_ref: (4, ho+1, wo+1, ci) bf16 even/odd spatial parity split of the
            zero-padded image (stride-2 conv taps are contiguous slices).
    o_ref : (1, CPAD) f32 per-image feature row (conv5 output, spatial mean).
    """
    cpad = o_ref.shape[-1]
    ci = xs_ref.shape[-1]
    kpad = w1_ref.shape[0]

    xv = xs_ref[...]                                        # (4, ho+1, wo+1, ci) bf16

    # conv1 (3x3, stride 2, pad 1, no bias) + folded BN + ReLU as ONE im2col
    # matmul: concatenate the 9 taps along channels in VMEM, single MXU dot.
    taps = []
    for kh in range(3):
        for kw in range(3):
            p = (kh % 2) * 2 + (kw % 2)
            qh, qw = kh // 2, kw // 2
            taps.append(xv[p, qh:qh + ho, qw:qw + wo, :])   # (ho, wo, ci)
    if kpad > 9 * ci:
        taps.append(jnp.zeros((ho, wo, kpad - 9 * ci), xv.dtype))
    patches = jnp.concatenate(taps, axis=-1).reshape(ho * wo, kpad)
    y = jnp.dot(patches, w1_ref[...], preferred_element_type=jnp.float32)
    y = jnp.maximum(y + b1_ref[...], 0.0).astype(jnp.bfloat16)   # (ho*wo, cpad)

    # MaxPool2d(3, stride 2, pad 1) in bf16.  ReLU output >= 0, so zero padding
    # matches PyTorch's -inf padding, and even-centred windows only ever read
    # the top row / left column of padding.
    yc = y.reshape(ho, wp, 2, cpad)
    ev = yc[:, :, 0, :]                                     # cols 2c
    od = yc[:, :, 1, :]                                     # cols 2c+1
    zc = jnp.zeros((ho, 1, cpad), y.dtype)
    if wp > 1:
        pod = jnp.concatenate([zc, od[:, :wp - 1, :]], axis=1)  # cols 2c-1
    else:
        pod = zc
    cmax = jnp.maximum(jnp.maximum(ev, od), pod)            # (ho, wp, cpad)

    cr = cmax.reshape(hp, 2, wp, cpad)
    rev = cr[:, 0, :, :]                                    # rows 2r
    rod = cr[:, 1, :, :]                                    # rows 2r+1
    zr = jnp.zeros((1, wp, cpad), y.dtype)
    if hp > 1:
        prd = jnp.concatenate([zr, rod[:hp - 1, :, :]], axis=0)  # rows 2r-1
    else:
        prd = zr
    pool = jnp.maximum(jnp.maximum(rev, rod), prd)          # (hp, wp, cpad)

    # conv5 (1x1) + folded BN + ReLU + spatial mean, still in VMEM.
    pv = pool.reshape(hp * wp, cpad)
    y5 = jnp.dot(pv, w5_ref[...], preferred_element_type=jnp.float32)
    y5 = jnp.maximum(y5 + b5_ref[...], 0.0)
    o_ref[...] = jnp.mean(y5, axis=0, keepdims=True).astype(o_ref.dtype)


def features_fused(xs, w1, b1, w5, b5, *, ho, wo, hp, wp):
    # TODO(synk): for large spatial inputs (e.g. 224x224) additionally tile the
    # kernel over output-row blocks (1-row pool halo) to bound live per-image
    # VMEM on v7x; the per-image tiles here are small.
    n, _, hc, wc_, ci = xs.shape
    cp = w1.shape[1]
    kern = functools.partial(_features_kernel, ho=ho, wo=wo, hp=hp, wp=wp)
    cost = pl.CostEstimate(
        flops=2 * n * (ho * wo * w1.shape[0] * cp + hp * wp * cp * cp),
        transcendentals=0,
        bytes_accessed=int(xs.size * xs.dtype.itemsize
                           + (w1.size + w5.size) * 2 + n * cp * 4))
    out = pl.pallas_call(
        kern,
        out_shape=jax.ShapeDtypeStruct((n, 1, cp), jnp.float32),
        grid=(n,),
        in_specs=[
            pl.BlockSpec((None, 4, hc, wc_, ci), lambda i: (i, 0, 0, 0, 0)),
            pl.BlockSpec(w1.shape, lambda i: (0, 0)),
            pl.BlockSpec(b1.shape, lambda i: (0, 0)),
            pl.BlockSpec(w5.shape, lambda i: (0, 0)),
            pl.BlockSpec(b5.shape, lambda i: (0, 0)),
        ],
        out_specs=pl.BlockSpec((None, 1, cp), lambda i: (i, 0, 0)),
        compiler_params=pltpu.CompilerParams(
            dimension_semantics=("parallel",),
            vmem_limit_bytes=_vmem_limit_bytes()),
        cost_estimate=cost,
    )(xs, w1, b1, w5, b5)
    return out.reshape(n, cp)


# ----------- kernel 2: 4x conv1d('same') + BN + ReLU + temporal mean + Linear -----------

def _temporal_head_kernel(x_ref, w_ref, b_ref, wc_ref, bc_ref, o_ref, *, t_len):
    m, c = x_ref.shape                       # m = samples_in_block * t_len
    n_layers = w_ref.shape[0]
    t_idx = lax.broadcasted_iota(jnp.int32, (m, 1), 0) % t_len
    first = t_idx == 0
    last = t_idx == t_len - 1

    s = x_ref[...]                                           # (m, c) f32
    for li in range(n_layers):
        sb = s.astype(jnp.bfloat16)
        p_prev = jnp.dot(sb, w_ref[li, 0], preferred_element_type=jnp.float32)
        p_mid = jnp.dot(sb, w_ref[li, 1], preferred_element_type=jnp.float32)
        p_next = jnp.dot(sb, w_ref[li, 2], preferred_element_type=jnp.float32)
        # 'same' padding along time: shifts on the XLU, boundary rows masked
        # (masking also kills cross-sample wrap-around from the roll).
        from_prev = pltpu.roll(p_prev, shift=1, axis=0)          # row t <- t-1
        from_next = pltpu.roll(p_next, shift=m - 1, axis=0)      # row t <- t+1
        acc = p_mid + jnp.where(first, 0.0, from_prev)
        acc = acc + jnp.where(last, 0.0, from_next)
        s = jnp.maximum(acc + b_ref[li], 0.0)

    ns = m // t_len
    sm = jnp.mean(s.reshape(ns, t_len, c), axis=1)               # temporal mean
    o_ref[...] = (jnp.dot(sm.astype(jnp.bfloat16), wc_ref[...],
                          preferred_element_type=jnp.float32) + bc_ref[...])


def _pick_sample_tile(ns, t_len, max_rows=2048):
    """Sample tile: input rows multiple of 8 (or full array), output rows
    multiple of 8 (or full), preferring >=2 grid steps (v7x has 2 cores)."""
    cands = []
    for st in range(1, ns + 1):
        if ns % st:
            continue
        if st * t_len > max_rows and st != ns:
            continue
        if (st * t_len % 8 == 0 or st == ns) and (st % 8 == 0 or st == ns):
            cands.append(st)
    if not cands:
        return ns
    multi = [st for st in cands if ns // st >= 2]
    return max(multi) if multi else max(cands)


def temporal_head(feats, w_all, b_all, wc, bc, t_len):
    m, c = feats.shape
    ns = m // t_len
    st = _pick_sample_tile(ns, t_len)
    ncp = wc.shape[1]
    return pl.pallas_call(
        functools.partial(_temporal_head_kernel, t_len=t_len),
        out_shape=jax.ShapeDtypeStruct((ns, ncp), jnp.float32),
        grid=(ns // st,),
        in_specs=[
            pl.BlockSpec((st * t_len, c), lambda i: (i, 0)),
            pl.BlockSpec(w_all.shape, lambda i: (0, 0, 0, 0)),
            pl.BlockSpec(b_all.shape, lambda i: (0, 0, 0)),
            pl.BlockSpec(wc.shape, lambda i: (0, 0)),
            pl.BlockSpec(bc.shape, lambda i: (0, 0)),
        ],
        out_specs=pl.BlockSpec((st, ncp), lambda i: (i, 0)),
        compiler_params=pltpu.CompilerParams(
            dimension_semantics=("parallel",),
            vmem_limit_bytes=_vmem_limit_bytes()),
    )(feats, w_all, b_all, wc, bc)


# ------------------------------ parameters ------------------------------

def init_raw_params(key, stages_out_channels, num_classes):
    c0 = stages_out_channels[0]
    c5 = stages_out_channels[-1]
    ks = jax.random.split(key, 18)

    def normal(k, shape, s=0.1):
        return s * jax.random.normal(k, shape, dtype=jnp.float32)

    def bn(k, c):
        k1, k2, k3, k4 = jax.random.split(k, 4)
        gamma = 1.0 + 0.1 * jax.random.normal(k1, (c,), jnp.float32)
        beta = 0.1 * jax.random.normal(k2, (c,), jnp.float32)
        mean = 0.1 * jax.random.normal(k3, (c,), jnp.float32)
        var = 1.0 + 0.1 * jnp.abs(jax.random.normal(k4, (c,), jnp.float32))
        return gamma, beta, mean, var

    p = {}
    p['conv1_w'] = normal(ks[0], (c0, 3, 3, 3))               # (Cout, Cin, kh, kw)
    p['conv1_bn'] = bn(ks[1], c0)
    p['conv5_w'] = normal(ks[2], (c5, stages_out_channels[3], 1, 1))
    p['conv5_bn'] = bn(ks[3], c5)
    conv1d_specs = [(c5, 64), (64, 64), (64, 128), (128, 128)]
    for idx, (cin, cout) in enumerate(conv1d_specs):
        p[f'conv1d_{idx}_w'] = normal(ks[4 + 3 * idx], (cout, cin, 3))
        p[f'conv1d_{idx}_b'] = normal(ks[5 + 3 * idx], (cout,))
        p[f'conv1d_{idx}_bn'] = bn(ks[6 + 3 * idx], cout)
    p['fc_w'] = normal(ks[16], (num_classes, 128))
    p['fc_b'] = normal(ks[17], (num_classes,))
    return p


def _pad2(a, rows, cols):
    return jnp.pad(a, ((0, rows - a.shape[0]), (0, cols - a.shape[1])))


def _fold_bn(bn_params, conv_bias=None):
    gamma, beta, mean, var = bn_params
    scale = gamma / jnp.sqrt(var + EPS)
    cb = 0.0 if conv_bias is None else conv_bias
    bias = (cb - mean) * scale + beta
    return scale, bias


def prepare_params(raw):
    """Fold eval-mode BatchNorm into weights/biases, pad channels to CPAD and
    cast MXU operands to bf16 (one-time constant folding)."""
    p = {}

    # conv1: Conv2d(3, C0, 3, s2, p1, bias=False) + BN, as an im2col weight
    # with rows ordered (kh, kw, cin) and zero-padded to KPAD.
    scale, bias = _fold_bn(raw['conv1_bn'])
    c0 = raw['conv1_w'].shape[0]
    w = jnp.transpose(raw['conv1_w'], (2, 3, 1, 0)).reshape(-1, c0) * scale[None, :]
    p['conv1_w'] = _pad2(w, KPAD, CPAD).astype(jnp.bfloat16)        # (32, 128)
    p['conv1_b'] = _pad2(bias[None, :], 1, CPAD).astype(jnp.float32)

    # conv5: 1x1 Conv2d(bias=False) + BN
    scale, bias = _fold_bn(raw['conv5_bn'])
    c5, cin = raw['conv5_w'].shape[:2]
    w = raw['conv5_w'].reshape(c5, cin).T * scale[None, :]
    p['conv5_w'] = _pad2(w, CPAD, CPAD).astype(jnp.bfloat16)
    p['conv5_b'] = _pad2(bias[None, :], 1, CPAD).astype(jnp.float32)

    # conv1d_0..3: Conv1d(k=3, 'same') + BN, stacked as (layer, tap, Cin, Cout)
    wts, bts = [], []
    for idx in range(4):
        wl = raw[f'conv1d_{idx}_w']                                 # (Cout, Cin, 3)
        scale, bias = _fold_bn(raw[f'conv1d_{idx}_bn'], raw[f'conv1d_{idx}_b'])
        taps = [_pad2(wl[:, :, k].T * scale[None, :], CPAD, CPAD) for k in range(3)]
        wts.append(jnp.stack(taps))
        bts.append(_pad2(bias[None, :], 1, CPAD))
    p['conv1d_w'] = jnp.stack(wts).astype(jnp.bfloat16)             # (4, 3, 128, 128)
    p['conv1d_b'] = jnp.stack(bts).astype(jnp.float32)              # (4, 1, 128)

    # classifier (bf16 weight for the MXU; f32 bias added after the dot)
    p['fc_w'] = _pad2(raw['fc_w'].T, CPAD, CPAD).astype(jnp.bfloat16)
    p['fc_b'] = _pad2(raw['fc_b'][None, :], 1, CPAD).astype(jnp.float32)
    return p


# ------------------------------ forward ------------------------------

def efficientface_temporal_forward(params, x_nchw, im_per_sample, num_classes):
    n, cin, h, w = x_nchw.shape
    assert h % 4 == 0 and w % 4 == 0, "spatial dims must be multiples of 4"
    assert n % im_per_sample == 0, "Batch size is not a multiple of sequence length."
    ho, wo = h // 2, w // 2
    hp, wp = ho // 2, wo // 2

    # ---- forward_features ----
    # NCHW -> NHWC (bf16), zero pad, even/odd spatial parity split.  One XLA
    # relayout pass over 1x the input; the stride-2 conv taps then become
    # contiguous slices inside the kernel (no im2col blowup in HBM).
    # TODO(synk): fold this relayout into the kernel via strided sublane reads
    # if the wrapper pass ever shows up for large inputs.
    xh = jnp.transpose(x_nchw, (0, 2, 3, 1)).astype(jnp.bfloat16)
    xp = jnp.pad(xh, ((0, 0), (1, 1), (1, 1), (0, 0)))
    xs = xp.reshape(n, ho + 1, 2, wo + 1, 2, cin)
    xs = jnp.transpose(xs, (0, 2, 4, 1, 3, 5)).reshape(n, 4, ho + 1, wo + 1, cin)

    # conv1+BN+ReLU -> maxpool -> conv5+BN+ReLU -> spatial mean, fully fused.
    # TODO(synk): stage2/3/4 (InvertedResidual), Modulator and
    # LocalFeatureExtractor are skipped (class definitions not provided).
    feats = features_fused(xs, params['conv1_w'], params['conv1_b'],
                           params['conv5_w'], params['conv5_b'],
                           ho=ho, wo=wo, hp=hp, wp=wp)              # (n, CPAD) f32

    # ---- forward_stage1 / forward_stage2 / forward_classifier (fused) ----
    logits = temporal_head(feats, params['conv1d_w'], params['conv1d_b'],
                           params['fc_w'], params['fc_b'], im_per_sample)
    return logits[:, :num_classes]


# -------------------------------- main --------------------------------

if __name__ == "__main__":
    stages_out_channels = [4, 4, 4, 4, 32]
    num_classes = 7
    im_per_sample = 4
    n_samples = 2

    key = jax.random.PRNGKey(0)
    kx, kp = jax.random.split(key)
    # PyTorch-style NCHW input, batch = n_samples * im_per_sample
    x = jax.random.normal(kx, (n_samples * im_per_sample, 3, 16, 16),
                          dtype=jnp.float32)
    raw = init_raw_params(kp, stages_out_channels, num_classes)
    params = prepare_params(raw)

    fwd = jax.jit(functools.partial(efficientface_temporal_forward,
                                    im_per_sample=im_per_sample,
                                    num_classes=num_classes))
    out = jax.block_until_ready(fwd(params, x))
    assert out.shape == (n_samples, num_classes)
    print("KERNEL_OK")
</pallas_src>

<mosaic_0001>
module attributes {stable_mosaic.version = 11 : i64} {
  func.func @_features_kernel(%arg0: i32, %arg1: memref<1x4x9x9x3xbf16, #tpu.memory_space<vmem>>, %arg2: memref<32x128xbf16, #tpu.memory_space<vmem>>, %arg3: memref<1x128xf32, #tpu.memory_space<vmem>>, %arg4: memref<128x128xbf16, #tpu.memory_space<vmem>>, %arg5: memref<1x128xf32, #tpu.memory_space<vmem>>, %arg6: memref<1x1x128xf32, #tpu.memory_space<vmem>>) attributes {dimension_semantics = [#tpu.dimension_semantics<parallel>], iteration_bounds = array<i64: 8>, scalar_prefetch = 0 : i64, scratch_operands = 0 : i64, tpu.core_type = #tpu.core_type<tc>, window_params = [{transform_indices = @transform_0, window_bounds = array<i64: 1, 4, 9, 9, 3>}, {pipeline_mode = #tpu.pipeline_mode<synchronous>, transform_indices = @transform_1, window_bounds = array<i64: 32, 128>}, {pipeline_mode = #tpu.pipeline_mode<synchronous>, transform_indices = @transform_2, window_bounds = array<i64: 1, 128>}, {pipeline_mode = #tpu.pipeline_mode<synchronous>, transform_indices = @transform_3, window_bounds = array<i64: 128, 128>}, {pipeline_mode = #tpu.pipeline_mode<synchronous>, transform_indices = @transform_4, window_bounds = array<i64: 1, 128>}, {transform_indices = @transform_5, window_bounds = array<i64: 1, 1, 128>}]} {
    %c0 = arith.constant 0 : index
    %c0_0 = arith.constant 0 : index
    %c0_1 = arith.constant 0 : index
    %c0_2 = arith.constant 0 : index
    %c0_3 = arith.constant 0 : index
    %0 = vector.load %arg1[%c0, %c0_0, %c0_1, %c0_2, %c0_3] : memref<1x4x9x9x3xbf16, #tpu.memory_space<vmem>>, vector<1x4x9x9x3xbf16>
    %1 = vector.shape_cast %0 : vector<1x4x9x9x3xbf16> to vector<4x9x9x3xbf16>
    %2 = vector.extract_strided_slice %1 {offsets = [0, 0, 0, 0], sizes = [1, 8, 8, 3], strides = [1, 1, 1, 1]} : vector<4x9x9x3xbf16> to vector<1x8x8x3xbf16>
    %3 = vector.shape_cast %2 : vector<1x8x8x3xbf16> to vector<8x8x3xbf16>
    %4 = vector.extract_strided_slice %1 {offsets = [1, 0, 0, 0], sizes = [1, 8, 8, 3], strides = [1, 1, 1, 1]} : vector<4x9x9x3xbf16> to vector<1x8x8x3xbf16>
    %5 = vector.shape_cast %4 : vector<1x8x8x3xbf16> to vector<8x8x3xbf16>
    %6 = vector.extract_strided_slice %1 {offsets = [0, 0, 1, 0], sizes = [1, 8, 8, 3], strides = [1, 1, 1, 1]} : vector<4x9x9x3xbf16> to vector<1x8x8x3xbf16>
    %7 = vector.shape_cast %6 : vector<1x8x8x3xbf16> to vector<8x8x3xbf16>
    %8 = vector.extract_strided_slice %1 {offsets = [2, 0, 0, 0], sizes = [1, 8, 8, 3], strides = [1, 1, 1, 1]} : vector<4x9x9x3xbf16> to vector<1x8x8x3xbf16>
    %9 = vector.shape_cast %8 : vector<1x8x8x3xbf16> to vector<8x8x3xbf16>
    %10 = vector.extract_strided_slice %1 {offsets = [3, 0, 0, 0], sizes = [1, 8, 8, 3], strides = [1, 1, 1, 1]} : vector<4x9x9x3xbf16> to vector<1x8x8x3xbf16>
    %11 = vector.shape_cast %10 : vector<1x8x8x3xbf16> to vector<8x8x3xbf16>
    %12 = vector.extract_strided_slice %1 {offsets = [2, 0, 1, 0], sizes = [1, 8, 8, 3], strides = [1, 1, 1, 1]} : vector<4x9x9x3xbf16> to vector<1x8x8x3xbf16>
    %13 = vector.shape_cast %12 : vector<1x8x8x3xbf16> to vector<8x8x3xbf16>
    %14 = vector.extract_strided_slice %1 {offsets = [0, 1, 0, 0], sizes = [1, 8, 8, 3], strides = [1, 1, 1, 1]} : vector<4x9x9x3xbf16> to vector<1x8x8x3xbf16>
    %15 = vector.shape_cast %14 : vector<1x8x8x3xbf16> to vector<8x8x3xbf16>
    %16 = vector.extract_strided_slice %1 {offsets = [1, 1, 0, 0], sizes = [1, 8, 8, 3], strides = [1, 1, 1, 1]} : vector<4x9x9x3xbf16> to vector<1x8x8x3xbf16>
    %17 = vector.shape_cast %16 : vector<1x8x8x3xbf16> to vector<8x8x3xbf16>
    %18 = vector.extract_strided_slice %1 {offsets = [0, 1, 1, 0], sizes = [1, 8, 8, 3], strides = [1, 1, 1, 1]} : vector<4x9x9x3xbf16> to vector<1x8x8x3xbf16>
    %19 = vector.shape_cast %18 : vector<1x8x8x3xbf16> to vector<8x8x3xbf16>
    %cst = arith.constant 0.000000e+00 : bf16
    %20 = vector.broadcast %cst : bf16 to vector<8x8x5xbf16>
    %21 = tpu.concatenate %3, %5, %7, %9, %11, %13, %15, %17, %19, %20 in 2 : vector<8x8x3xbf16>, vector<8x8x3xbf16>, vector<8x8x3xbf16>, vector<8x8x3xbf16>, vector<8x8x3xbf16>, vector<8x8x3xbf16>, vector<8x8x3xbf16>, vector<8x8x3xbf16>, vector<8x8x3xbf16>, vector<8x8x5xbf16> -> vector<8x8x32xbf16>
    %22 = vector.shape_cast %21 : vector<8x8x32xbf16> to vector<64x32xbf16>
    %c0_4 = arith.constant 0 : index
    %c0_5 = arith.constant 0 : index
    %23 = vector.load %arg2[%c0_4, %c0_5] : memref<32x128xbf16, #tpu.memory_space<vmem>>, vector<32x128xbf16>
    %cst_6 = arith.constant dense<0.000000e+00> : vector<64x128xf32>
    %24 = tpu.matmul %22, %23, %cst_6 {dimension_numbers = #tpu.dot_dimension_numbers<[1], [0], [0], [1], [0, 0, 1, 1], [], []>} : vector<64x32xbf16>, vector<32x128xbf16>, vector<64x128xf32> -> vector<64x128xf32>
    %c0_7 = arith.constant 0 : index
    %c0_8 = arith.constant 0 : index
    %25 = vector.load %arg3[%c0_7, %c0_8] : memref<1x128xf32, #tpu.memory_space<vmem>>, vector<1x128xf32>
    %26 = vector.broadcast %25 : vector<1x128xf32> to vector<64x128xf32>
    %27 = arith.addf %24, %26 : vector<64x128xf32>
    %cst_9 = arith.constant 0.000000e+00 : f32
    %28 = vector.broadcast %cst_9 : f32 to vector<64x128xf32>
    %29 = arith.maximumf %27, %28 : vector<64x128xf32>
    %30 = arith.truncf %29 : vector<64x128xf32> to vector<64x128xbf16>
    %31 = vector.shape_cast %30 : vector<64x128xbf16> to vector<8x4x2x128xbf16>
    %32 = vector.extract_strided_slice %31 {offsets = [0, 0, 0, 0], sizes = [8, 4, 1, 128], strides = [1, 1, 1, 1]} : vector<8x4x2x128xbf16> to vector<8x4x1x128xbf16>
    %33 = vector.shape_cast %32 : vector<8x4x1x128xbf16> to vector<8x4x128xbf16>
    %34 = vector.extract_strided_slice %31 {offsets = [0, 0, 1, 0], sizes = [8, 4, 1, 128], strides = [1, 1, 1, 1]} : vector<8x4x2x128xbf16> to vector<8x4x1x128xbf16>
    %35 = vector.shape_cast %34 : vector<8x4x1x128xbf16> to vector<8x4x128xbf16>
    %cst_10 = arith.constant 0.000000e+00 : bf16
    %36 = vector.broadcast %cst_10 : bf16 to vector<8x1x128xbf16>
    %37 = vector.extract_strided_slice %35 {offsets = [0, 0, 0], sizes = [8, 3, 128], strides = [1, 1, 1]} : vector<8x4x128xbf16> to vector<8x3x128xbf16>
    %38 = tpu.concatenate %36, %37 in 1 : vector<8x1x128xbf16>, vector<8x3x128xbf16> -> vector<8x4x128xbf16>
    %39 = arith.maximumf %33, %35 : vector<8x4x128xbf16>
    %40 = arith.maximumf %39, %38 : vector<8x4x128xbf16>
    %41 = vector.shape_cast %40 : vector<8x4x128xbf16> to vector<4x2x4x128xbf16>
    %42 = vector.extract_strided_slice %41 {offsets = [0, 0, 0, 0], sizes = [4, 1, 4, 128], strides = [1, 1, 1, 1]} : vector<4x2x4x128xbf16> to vector<4x1x4x128xbf16>
    %43 = vector.shape_cast %42 : vector<4x1x4x128xbf16> to vector<4x4x128xbf16>
    %44 = vector.extract_strided_slice %41 {offsets = [0, 1, 0, 0], sizes = [4, 1, 4, 128], strides = [1, 1, 1, 1]} : vector<4x2x4x128xbf16> to vector<4x1x4x128xbf16>
    %45 = vector.shape_cast %44 : vector<4x1x4x128xbf16> to vector<4x4x128xbf16>
    %cst_11 = arith.constant 0.000000e+00 : bf16
    %46 = vector.broadcast %cst_11 : bf16 to vector<1x4x128xbf16>
    %47 = vector.extract_strided_slice %45 {offsets = [0, 0, 0], sizes = [3, 4, 128], strides = [1, 1, 1]} : vector<4x4x128xbf16> to vector<3x4x128xbf16>
    %48 = tpu.concatenate %46, %47 in 0 : vector<1x4x128xbf16>, vector<3x4x128xbf16> -> vector<4x4x128xbf16>
    %49 = arith.maximumf %43, %45 : vector<4x4x128xbf16>
    %50 = arith.maximumf %49, %48 : vector<4x4x128xbf16>
    %51 = vector.shape_cast %50 : vector<4x4x128xbf16> to vector<16x128xbf16>
    %c0_12 = arith.constant 0 : index
    %c0_13 = arith.constant 0 : index
    %52 = vector.load %arg4[%c0_12, %c0_13] : memref<128x128xbf16, #tpu.memory_space<vmem>>, vector<128x128xbf16>
    %cst_14 = arith.constant dense<0.000000e+00> : vector<16x128xf32>
    %53 = tpu.matmul %51, %52, %cst_14 {dimension_numbers = #tpu.dot_dimension_numbers<[1], [0], [0], [1], [0, 0, 1, 1], [], []>} : vector<16x128xbf16>, vector<128x128xbf16>, vector<16x128xf32> -> vector<16x128xf32>
    %c0_15 = arith.constant 0 : index
    %c0_16 = arith.constant 0 : index
    %54 = vector.load %arg5[%c0_15, %c0_16] : memref<1x128xf32, #tpu.memory_space<vmem>>, vector<1x128xf32>
    %55 = vector.broadcast %54 : vector<1x128xf32> to vector<16x128xf32>
    %56 = arith.addf %53, %55 : vector<16x128xf32>
    %cst_17 = arith.constant 0.000000e+00 : f32
    %57 = vector.broadcast %cst_17 : f32 to vector<16x128xf32>
    %58 = arith.maximumf %56, %57 : vector<16x128xf32>
    %cst_18 = arith.constant dense<0.000000e+00> : vector<128xf32>
    %59 = vector.multi_reduction <add>, %58, %cst_18 [0] : vector<16x128xf32> to vector<128xf32>
    %60 = vector.shape_cast %59 : vector<128xf32> to vector<1x128xf32>
    %cst_19 = arith.constant 1.600000e+01 : f32
    %61 = vector.broadcast %cst_19 : f32 to vector<1x128xf32>
    %62 = arith.divf %60, %61 : vector<1x128xf32>
    %c0_20 = arith.constant 0 : index
    %c0_21 = arith.constant 0 : index
    %c0_22 = arith.constant 0 : index
    %63 = vector.load %arg6[%c0_20, %c0_21, %c0_22] : memref<1x1x128xf32, #tpu.memory_space<vmem>>, vector<1x1x128xf32>
    %64 = vector.shape_cast %63 : vector<1x1x128xf32> to vector<1x128xf32>
    %65 = vector.shape_cast %62 : vector<1x128xf32> to vector<1x1x128xf32>
    tpu.vector_store %arg6[%c0_20, %c0_21, %c0_22], %65 {strides = array<i32>} : memref<1x1x128xf32, #tpu.memory_space<vmem>>, vector<1x1x128xf32>,
    return
  }
  func.func @transform_0(%arg0: i32) -> (i32, i32, i32, i32, i32) {
    %c0_i32 = arith.constant 0 : i32
    %c0_i32_0 = arith.constant 0 : i32
    %c0_i32_1 = arith.constant 0 : i32
    %c0_i32_2 = arith.constant 0 : i32
    %c0_i32_3 = arith.constant 0 : i32
    return %arg0, %c0_i32, %c0_i32_0, %c0_i32_1, %c0_i32_2 : i32, i32, i32, i32, i32
  }
  func.func @transform_1(%arg0: i32) -> (i32, i32) {
    %c0_i32 = arith.constant 0 : i32
    %c0_i32_0 = arith.constant 0 : i32
    %c0_i32_1 = arith.constant 0 : i32
    return %c0_i32, %c0_i32_0 : i32, i32
  }
  func.func @transform_2(%arg0: i32) -> (i32, i32) {
    %c0_i32 = arith.constant 0 : i32
    %c0_i32_0 = arith.constant 0 : i32
    %c0_i32_1 = arith.constant 0 : i32
    return %c0_i32, %c0_i32_0 : i32, i32
  }
  func.func @transform_3(%arg0: i32) -> (i32, i32) {
    %c0_i32 = arith.constant 0 : i32
    %c0_i32_0 = arith.constant 0 : i32
    %c0_i32_1 = arith.constant 0 : i32
    return %c0_i32, %c0_i32_0 : i32, i32
  }
  func.func @transform_4(%arg0: i32) -> (i32, i32) {
    %c0_i32 = arith.constant 0 : i32
    %c0_i32_0 = arith.constant 0 : i32
    %c0_i32_1 = arith.constant 0 : i32
    return %c0_i32, %c0_i32_0 : i32, i32
  }
  func.func @transform_5(%arg0: i32) -> (i32, i32, i32) {
    %c0_i32 = arith.constant 0 : i32
    %c0_i32_0 = arith.constant 0 : i32
    %c0_i32_1 = arith.constant 0 : i32
    return %arg0, %c0_i32, %c0_i32_0 : i32, i32, i32
  }
}

module attributes {stable_mosaic.version = 11 : i64} {
  func.func @_temporal_head_kernel(%arg0: i32, %arg1: memref<8x128xf32, #tpu.memory_space<vmem>>, %arg2: memref<4x3x128x128xbf16, #tpu.memory_space<vmem>>, %arg3: memref<4x1x128xf32, #tpu.memory_space<vmem>>, %arg4: memref<128x128xbf16, #tpu.memory_space<vmem>>, %arg5: memref<1x128xf32, #tpu.memory_space<vmem>>, %arg6: memref<2x128xf32, #tpu.memory_space<vmem>>) attributes {dimension_semantics = [#tpu.dimension_semantics<parallel>], iteration_bounds = array<i64: 1>, scalar_prefetch = 0 : i64, scratch_operands = 0 : i64, tpu.core_type = #tpu.core_type<tc>, window_params = [{transform_indices = @transform_0, window_bounds = array<i64: 8, 128>}, {pipeline_mode = #tpu.pipeline_mode<synchronous>, transform_indices = @transform_1, window_bounds = array<i64: 4, 3, 128, 128>}, {pipeline_mode = #tpu.pipeline_mode<synchronous>, transform_indices = @transform_2, window_bounds = array<i64: 4, 1, 128>}, {pipeline_mode = #tpu.pipeline_mode<synchronous>, transform_indices = @transform_3, window_bounds = array<i64: 128, 128>}, {pipeline_mode = #tpu.pipeline_mode<synchronous>, transform_indices = @transform_4, window_bounds = array<i64: 1, 128>}, {transform_indices = @transform_5, window_bounds = array<i64: 2, 128>}]} {
    %0 = tpu.iota {dimensions = array<i32: 0>} : vector<8x1xi32>
    %c4_i32 = arith.constant 4 : i32
    %c0_i32 = arith.constant 0 : i32
    %1 = arith.cmpi eq, %c4_i32, %c0_i32 : i32
    %c1_i32 = arith.constant 1 : i32
    %2 = arith.select %1, %c1_i32, %c4_i32 : i32
    %3 = vector.broadcast %2 : i32 to vector<8x1xi32>
    %4 = arith.remsi %0, %3 : vector<8x1xi32>
    %c0_i32_0 = arith.constant 0 : i32
    %5 = vector.broadcast %c0_i32_0 : i32 to vector<8x1xi32>
    %6 = arith.cmpi ne, %4, %5 : vector<8x1xi32>
    %c0_i32_1 = arith.constant 0 : i32
    %7 = vector.broadcast %c0_i32_1 : i32 to vector<8x1xi32>
    %8 = arith.cmpi slt, %4, %7 : vector<8x1xi32>
    %c0_i32_2 = arith.constant 0 : i32
    %9 = arith.cmpi slt, %2, %c0_i32_2 : i32
    %10 = vector.broadcast %9 : i1 to vector<8x1xi1>
    %11 = vector.broadcast %10 : vector<8x1xi1> to vector<8x1xi1>
    %12 = arith.xori %8, %11 : vector<8x1xi1>
    %13 = arith.andi %12, %6 : vector<8x1xi1>
    %14 = vector.broadcast %2 : i32 to vector<8x1xi32>
    %15 = arith.addi %4, %14 : vector<8x1xi32>
    %16 = arith.select %13, %15, %4 : vector<8x1xi1>, vector<8x1xi32>
    %c0_i32_3 = arith.constant 0 : i32
    %17 = vector.broadcast %c0_i32_3 : i32 to vector<8x1xi32>
    %18 = arith.cmpi eq, %16, %17 : vector<8x1xi32>
    %c3_i32 = arith.constant 3 : i32
    %19 = vector.broadcast %c3_i32 : i32 to vector<8x1xi32>
    %20 = arith.cmpi eq, %16, %19 : vector<8x1xi32>
    %c0 = arith.constant 0 : index
    %c0_4 = arith.constant 0 : index
    %21 = vector.load %arg1[%c0, %c0_4] : memref<8x128xf32, #tpu.memory_space<vmem>>, vector<8x128xf32>
    %22 = arith.truncf %21 : vector<8x128xf32> to vector<8x128xbf16>
    %c0_5 = arith.constant 0 : index
    %c0_6 = arith.constant 0 : index
    %c0_7 = arith.constant 0 : index
    %c0_8 = arith.constant 0 : index
    %23 = vector.load %arg2[%c0_5, %c0_6, %c0_7, %c0_8] : memref<4x3x128x128xbf16, #tpu.memory_space<vmem>>, vector<1x1x128x128xbf16>
    %24 = vector.shape_cast %23 : vector<1x1x128x128xbf16> to vector<128x128xbf16>
    %cst = arith.constant dense<0.000000e+00> : vector<8x128xf32>
    %25 = tpu.matmul %22, %24, %cst {dimension_numbers = #tpu.dot_dimension_numbers<[1], [0], [0], [1], [0, 0, 1, 1], [], []>} : vector<8x128xbf16>, vector<128x128xbf16>, vector<8x128xf32> -> vector<8x128xf32>
    %c0_9 = arith.constant 0 : index
    %c1 = arith.constant 1 : index
    %c0_10 = arith.constant 0 : index
    %c0_11 = arith.constant 0 : index
    %26 = vector.load %arg2[%c0_9, %c1, %c0_10, %c0_11] : memref<4x3x128x128xbf16, #tpu.memory_space<vmem>>, vector<1x1x128x128xbf16>
    %27 = vector.shape_cast %26 : vector<1x1x128x128xbf16> to vector<128x128xbf16>
    %cst_12 = arith.constant dense<0.000000e+00> : vector<8x128xf32>
    %28 = tpu.matmul %22, %27, %cst_12 {dimension_numbers = #tpu.dot_dimension_numbers<[1], [0], [0], [1], [0, 0, 1, 1], [], []>} : vector<8x128xbf16>, vector<128x128xbf16>, vector<8x128xf32> -> vector<8x128xf32>
    %c0_13 = arith.constant 0 : index
    %c2 = arith.constant 2 : index
    %c0_14 = arith.constant 0 : index
    %c0_15 = arith.constant 0 : index
    %29 = vector.load %arg2[%c0_13, %c2, %c0_14, %c0_15] : memref<4x3x128x128xbf16, #tpu.memory_space<vmem>>, vector<1x1x128x128xbf16>
    %30 = vector.shape_cast %29 : vector<1x1x128x128xbf16> to vector<128x128xbf16>
    %cst_16 = arith.constant dense<0.000000e+00> : vector<8x128xf32>
    %31 = tpu.matmul %22, %30, %cst_16 {dimension_numbers = #tpu.dot_dimension_numbers<[1], [0], [0], [1], [0, 0, 1, 1], [], []>} : vector<8x128xbf16>, vector<128x128xbf16>, vector<8x128xf32> -> vector<8x128xf32>
    %c1_i32_17 = arith.constant 1 : i32
    %32 = tpu.dynamic_rotate %25 by %c1_i32_17 dim 0 : vector<8x128xf32>, i32 -> vector<8x128xf32>
    %c7_i32 = arith.constant 7 : i32
    %33 = tpu.dynamic_rotate %31 by %c7_i32 dim 0 : vector<8x128xf32>, i32 -> vector<8x128xf32>
    %cst_18 = arith.constant 0.000000e+00 : f32
    %34 = vector.shape_cast %18 : vector<8x1xi1> to vector<8x1xi1>
    %35 = vector.broadcast %34 : vector<8x1xi1> to vector<8x128xi1>
    %36 = vector.broadcast %cst_18 : f32 to vector<8x128xf32>
    %37 = arith.select %35, %36, %32 : vector<8x128xi1>, vector<8x128xf32>
    %38 = arith.addf %28, %37 : vector<8x128xf32>
    %cst_19 = arith.constant 0.000000e+00 : f32
    %39 = vector.shape_cast %20 : vector<8x1xi1> to vector<8x1xi1>
    %40 = vector.broadcast %39 : vector<8x1xi1> to vector<8x128xi1>
    %41 = vector.broadcast %cst_19 : f32 to vector<8x128xf32>
    %42 = arith.select %40, %41, %33 : vector<8x128xi1>, vector<8x128xf32>
    %43 = arith.addf %38, %42 : vector<8x128xf32>
    %c0_20 = arith.constant 0 : index
    %c0_21 = arith.constant 0 : index
    %c0_22 = arith.constant 0 : index
    %44 = vector.load %arg3[%c0_20, %c0_21, %c0_22] : memref<4x1x128xf32, #tpu.memory_space<vmem>>, vector<1x1x128xf32>
    %45 = vector.shape_cast %44 : vector<1x1x128xf32> to vector<1x128xf32>
    %46 = vector.broadcast %45 : vector<1x128xf32> to vector<8x128xf32>
    %47 = arith.addf %43, %46 : vector<8x128xf32>
    %cst_23 = arith.constant 0.000000e+00 : f32
    %48 = vector.broadcast %cst_23 : f32 to vector<8x128xf32>
    %49 = arith.maximumf %47, %48 : vector<8x128xf32>
    %50 = arith.truncf %49 : vector<8x128xf32> to vector<8x128xbf16>
    %c1_24 = arith.constant 1 : index
    %c0_25 = arith.constant 0 : index
    %c0_26 = arith.constant 0 : index
    %c0_27 = arith.constant 0 : index
    %51 = vector.load %arg2[%c1_24, %c0_25, %c0_26, %c0_27] : memref<4x3x128x128xbf16, #tpu.memory_space<vmem>>, vector<1x1x128x128xbf16>
    %52 = vector.shape_cast %51 : vector<1x1x128x128xbf16> to vector<128x128xbf16>
    %cst_28 = arith.constant dense<0.000000e+00> : vector<8x128xf32>
    %53 = tpu.matmul %50, %52, %cst_28 {dimension_numbers = #tpu.dot_dimension_numbers<[1], [0], [0], [1], [0, 0, 1, 1], [], []>} : vector<8x128xbf16>, vector<128x128xbf16>, vector<8x128xf32> -> vector<8x128xf32>
    %c1_29 = arith.constant 1 : index
    %c1_30 = arith.constant 1 : index
    %c0_31 = arith.constant 0 : index
    %c0_32 = arith.constant 0 : index
    %54 = vector.load %arg2[%c1_29, %c1_30, %c0_31, %c0_32] : memref<4x3x128x128xbf16, #tpu.memory_space<vmem>>, vector<1x1x128x128xbf16>
    %55 = vector.shape_cast %54 : vector<1x1x128x128xbf16> to vector<128x128xbf16>
    %cst_33 = arith.constant dense<0.000000e+00> : vector<8x128xf32>
    %56 = tpu.matmul %50, %55, %cst_33 {dimension_numbers = #tpu.dot_dimension_numbers<[1], [0], [0], [1], [0, 0, 1, 1], [], []>} : vector<8x128xbf16>, vector<128x128xbf16>, vector<8x128xf32> -> vector<8x128xf32>
    %c1_34 = arith.constant 1 : index
    %c2_35 = arith.constant 2 : index
    %c0_36 = arith.constant 0 : index
    %c0_37 = arith.constant 0 : index
    %57 = vector.load %arg2[%c1_34, %c2_35, %c0_36, %c0_37] : memref<4x3x128x128xbf16, #tpu.memory_space<vmem>>, vector<1x1x128x128xbf16>
    %58 = vector.shape_cast %57 : vector<1x1x128x128xbf16> to vector<128x128xbf16>
    %cst_38 = arith.constant dense<0.000000e+00> : vector<8x128xf32>
    %59 = tpu.matmul %50, %58, %cst_38 {dimension_numbers = #tpu.dot_dimension_numbers<[1], [0], [0], [1], [0, 0, 1, 1], [], []>} : vector<8x128xbf16>, vector<128x128xbf16>, vector<8x128xf32> -> vector<8x128xf32>
    %c1_i32_39 = arith.constant 1 : i32
    %60 = tpu.dynamic_rotate %53 by %c1_i32_39 dim 0 : vector<8x128xf32>, i32 -> vector<8x128xf32>
    %c7_i32_40 = arith.constant 7 : i32
    %61 = tpu.dynamic_rotate %59 by %c7_i32_40 dim 0 : vector<8x128xf32>, i32 -> vector<8x128xf32>
    %cst_41 = arith.constant 0.000000e+00 : f32
    %62 = vector.shape_cast %18 : vector<8x1xi1> to vector<8x1xi1>
    %63 = vector.broadcast %62 : vector<8x1xi1> to vector<8x128xi1>
    %64 = vector.broadcast %cst_41 : f32 to vector<8x128xf32>
    %65 = arith.select %63, %64, %60 : vector<8x128xi1>, vector<8x128xf32>
    %66 = arith.addf %56, %65 : vector<8x128xf32>
    %cst_42 = arith.constant 0.000000e+00 : f32
    %67 = vector.shape_cast %20 : vector<8x1xi1> to vector<8x1xi1>
    %68 = vector.broadcast %67 : vector<8x1xi1> to vector<8x128xi1>
    %69 = vector.broadcast %cst_42 : f32 to vector<8x128xf32>
    %70 = arith.select %68, %69, %61 : vector<8x128xi1>, vector<8x128xf32>
    %71 = arith.addf %66, %70 : vector<8x128xf32>
    %c1_43 = arith.constant 1 : index
    %c0_44 = arith.constant 0 : index
    %c0_45 = arith.constant 0 : index
    %72 = vector.load %arg3[%c1_43, %c0_44, %c0_45] : memref<4x1x128xf32, #tpu.memory_space<vmem>>, vector<1x1x128xf32>
    %73 = vector.shape_cast %72 : vector<1x1x128xf32> to vector<1x128xf32>
    %74 = vector.broadcast %73 : vector<1x128xf32> to vector<8x128xf32>
    %75 = arith.addf %71, %74 : vector<8x128xf32>
    %cst_46 = arith.constant 0.000000e+00 : f32
    %76 = vector.broadcast %cst_46 : f32 to vector<8x128xf32>
    %77 = arith.maximumf %75, %76 : vector<8x128xf32>
    %78 = arith.truncf %77 : vector<8x128xf32> to vector<8x128xbf16>
    %c2_47 = arith.constant 2 : index
    %c0_48 = arith.constant 0 : index
    %c0_49 = arith.constant 0 : index
    %c0_50 = arith.constant 0 : index
    %79 = vector.load %arg2[%c2_47, %c0_48, %c0_49, %c0_50] : memref<4x3x128x128xbf16, #tpu.memory_space<vmem>>, vector<1x1x128x128xbf16>
    %80 = vector.shape_cast %79 : vector<1x1x128x128xbf16> to vector<128x128xbf16>
    %cst_51 = arith.constant dense<0.000000e+00> : vector<8x128xf32>
    %81 = tpu.matmul %78, %80, %cst_51 {dimension_numbers = #tpu.dot_dimension_numbers<[1], [0], [0], [1], [0, 0, 1, 1], [], []>} : vector<8x128xbf16>, vector<128x128xbf16>, vector<8x128xf32> -> vector<8x128xf32>
    %c2_52 = arith.constant 2 : index
    %c1_53 = arith.constant 1 : index
    %c0_54 = arith.constant 0 : index
    %c0_55 = arith.constant 0 : index
    %82 = vector.load %arg2[%c2_52, %c1_53, %c0_54, %c0_55] : memref<4x3x128x128xbf16, #tpu.memory_space<vmem>>, vector<1x1x128x128xbf16>
    %83 = vector.shape_cast %82 : vector<1x1x128x128xbf16> to vector<128x128xbf16>
    %cst_56 = arith.constant dense<0.000000e+00> : vector<8x128xf32>
    %84 = tpu.matmul %78, %83, %cst_56 {dimension_numbers = #tpu.dot_dimension_numbers<[1], [0], [0], [1], [0, 0, 1, 1], [], []>} : vector<8x128xbf16>, vector<128x128xbf16>, vector<8x128xf32> -> vector<8x128xf32>
    %c2_57 = arith.constant 2 : index
    %c2_58 = arith.constant 2 : index
    %c0_59 = arith.constant 0 : index
    %c0_60 = arith.constant 0 : index
    %85 = vector.load %arg2[%c2_57, %c2_58, %c0_59, %c0_60] : memref<4x3x128x128xbf16, #tpu.memory_space<vmem>>, vector<1x1x128x128xbf16>
    %86 = vector.shape_cast %85 : vector<1x1x128x128xbf16> to vector<128x128xbf16>
    %cst_61 = arith.constant dense<0.000000e+00> : vector<8x128xf32>
    %87 = tpu.matmul %78, %86, %cst_61 {dimension_numbers = #tpu.dot_dimension_numbers<[1], [0], [0], [1], [0, 0, 1, 1], [], []>} : vector<8x128xbf16>, vector<128x128xbf16>, vector<8x128xf32> -> vector<8x128xf32>
    %c1_i32_62 = arith.constant 1 : i32
    %88 = tpu.dynamic_rotate %81 by %c1_i32_62 dim 0 : vector<8x128xf32>, i32 -> vector<8x128xf32>
    %c7_i32_63 = arith.constant 7 : i32
    %89 = tpu.dynamic_rotate %87 by %c7_i32_63 dim 0 : vector<8x128xf32>, i32 -> vector<8x128xf32>
    %cst_64 = arith.constant 0.000000e+00 : f32
    %90 = vector.shape_cast %18 : vector<8x1xi1> to vector<8x1xi1>
    %91 = vector.broadcast %90 : vector<8x1xi1> to vector<8x128xi1>
    %92 = vector.broadcast %cst_64 : f32 to vector<8x128xf32>
    %93 = arith.select %91, %92, %88 : vector<8x128xi1>, vector<8x128xf32>
    %94 = arith.addf %84, %93 : vector<8x128xf32>
    %cst_65 = arith.constant 0.000000e+00 : f32
    %95 = vector.shape_cast %20 : vector<8x1xi1> to vector<8x1xi1>
    %96 = vector.broadcast %95 : vector<8x1xi1> to vector<8x128xi1>
    %97 = vector.broadcast %cst_65 : f32 to vector<8x128xf32>
    %98 = arith.select %96, %97, %89 : vector<8x128xi1>, vector<8x128xf32>
    %99 = arith.addf %94, %98 : vector<8x128xf32>
    %c2_66 = arith.constant 2 : index
    %c0_67 = arith.constant 0 : index
    %c0_68 = arith.constant 0 : index
    %100 = vector.load %arg3[%c2_66, %c0_67, %c0_68] : memref<4x1x128xf32, #tpu.memory_space<vmem>>, vector<1x1x128xf32>
    %101 = vector.shape_cast %100 : vector<1x1x128xf32> to vector<1x128xf32>
    %102 = vector.broadcast %101 : vector<1x128xf32> to vector<8x128xf32>
    %103 = arith.addf %99, %102 : vector<8x128xf32>
    %cst_69 = arith.constant 0.000000e+00 : f32
    %104 = vector.broadcast %cst_69 : f32 to vector<8x128xf32>
    %105 = arith.maximumf %103, %104 : vector<8x128xf32>
    %106 = arith.truncf %105 : vector<8x128xf32> to vector<8x128xbf16>
    %c3 = arith.constant 3 : index
    %c0_70 = arith.constant 0 : index
    %c0_71 = arith.constant 0 : index
    %c0_72 = arith.constant 0 : index
    %107 = vector.load %arg2[%c3, %c0_70, %c0_71, %c0_72] : memref<4x3x128x128xbf16, #tpu.memory_space<vmem>>, vector<1x1x128x128xbf16>
    %108 = vector.shape_cast %107 : vector<1x1x128x128xbf16> to vector<128x128xbf16>
    %cst_73 = arith.constant dense<0.000000e+00> : vector<8x128xf32>
    %109 = tpu.matmul %106, %108, %cst_73 {dimension_numbers = #tpu.dot_dimension_numbers<[1], [0], [0], [1], [0, 0, 1, 1], [], []>} : vector<8x128xbf16>, vector<128x128xbf16>, vector<8x128xf32> -> vector<8x128xf32>
    %c3_74 = arith.constant 3 : index
    %c1_75 = arith.constant 1 : index
    %c0_76 = arith.constant 0 : index
    %c0_77 = arith.constant 0 : index
    %110 = vector.load %arg2[%c3_74, %c1_75, %c0_76, %c0_77] : memref<4x3x128x128xbf16, #tpu.memory_space<vmem>>, vector<1x1x128x128xbf16>
    %111 = vector.shape_cast %110 : vector<1x1x128x128xbf16> to vector<128x128xbf16>
    %cst_78 = arith.constant dense<0.000000e+00> : vector<8x128xf32>
    %112 = tpu.matmul %106, %111, %cst_78 {dimension_numbers = #tpu.dot_dimension_numbers<[1], [0], [0], [1], [0, 0, 1, 1], [], []>} : vector<8x128xbf16>, vector<128x128xbf16>, vector<8x128xf32> -> vector<8x128xf32>
    %c3_79 = arith.constant 3 : index
    %c2_80 = arith.constant 2 : index
    %c0_81 = arith.constant 0 : index
    %c0_82 = arith.constant 0 : index
    %113 = vector.load %arg2[%c3_79, %c2_80, %c0_81, %c0_82] : memref<4x3x128x128xbf16, #tpu.memory_space<vmem>>, vector<1x1x128x128xbf16>
    %114 = vector.shape_cast %113 : vector<1x1x128x128xbf16> to vector<128x128xbf16>
    %cst_83 = arith.constant dense<0.000000e+00> : vector<8x128xf32>
    %115 = tpu.matmul %106, %114, %cst_83 {dimension_numbers = #tpu.dot_dimension_numbers<[1], [0], [0], [1], [0, 0, 1, 1], [], []>} : vector<8x128xbf16>, vector<128x128xbf16>, vector<8x128xf32> -> vector<8x128xf32>
    %c1_i32_84 = arith.constant 1 : i32
    %116 = tpu.dynamic_rotate %109 by %c1_i32_84 dim 0 : vector<8x128xf32>, i32 -> vector<8x128xf32>
    %c7_i32_85 = arith.constant 7 : i32
    %117 = tpu.dynamic_rotate %115 by %c7_i32_85 dim 0 : vector<8x128xf32>, i32 -> vector<8x128xf32>
    %cst_86 = arith.constant 0.000000e+00 : f32
    %118 = vector.shape_cast %18 : vector<8x1xi1> to vector<8x1xi1>
    %119 = vector.broadcast %118 : vector<8x1xi1> to vector<8x128xi1>
    %120 = vector.broadcast %cst_86 : f32 to vector<8x128xf32>
    %121 = arith.select %119, %120, %116 : vector<8x128xi1>, vector<8x128xf32>
    %122 = arith.addf %112, %121 : vector<8x128xf32>
    %cst_87 = arith.constant 0.000000e+00 : f32
    %123 = vector.shape_cast %20 : vector<8x1xi1> to vector<8x1xi1>
    %124 = vector.broadcast %123 : vector<8x1xi1> to vector<8x128xi1>
    %125 = vector.broadcast %cst_87 : f32 to vector<8x128xf32>
    %126 = arith.select %124, %125, %117 : vector<8x128xi1>, vector<8x128xf32>
    %127 = arith.addf %122, %126 : vector<8x128xf32>
    %c3_88 = arith.constant 3 : index
    %c0_89 = arith.constant 0 : index
    %c0_90 = arith.constant 0 : index
    %128 = vector.load %arg3[%c3_88, %c0_89, %c0_90] : memref<4x1x128xf32, #tpu.memory_space<vmem>>, vector<1x1x128xf32>
    %129 = vector.shape_cast %128 : vector<1x1x128xf32> to vector<1x128xf32>
    %130 = vector.broadcast %129 : vector<1x128xf32> to vector<8x128xf32>
    %131 = arith.addf %127, %130 : vector<8x128xf32>
    %cst_91 = arith.constant 0.000000e+00 : f32
    %132 = vector.broadcast %cst_91 : f32 to vector<8x128xf32>
    %133 = arith.maximumf %131, %132 : vector<8x128xf32>
    %134 = vector.shape_cast %133 : vector<8x128xf32> to vector<2x4x128xf32>
    %cst_92 = arith.constant dense<0.000000e+00> : vector<2x128xf32>
    %135 = vector.multi_reduction <add>, %134, %cst_92 [1] : vector<2x4x128xf32> to vector<2x128xf32>
    %cst_93 = arith.constant 4.000000e+00 : f32
    %136 = vector.broadcast %cst_93 : f32 to vector<2x128xf32>
    %137 = arith.divf %135, %136 : vector<2x128xf32>
    %138 = arith.truncf %137 : vector<2x128xf32> to vector<2x128xbf16>
    %c0_94 = arith.constant 0 : index
    %c0_95 = arith.constant 0 : index
    %139 = vector.load %arg4[%c0_94, %c0_95] : memref<128x128xbf16, #tpu.memory_space<vmem>>, vector<128x128xbf16>
    %cst_96 = arith.constant dense<0.000000e+00> : vector<2x128xf32>
    %140 = tpu.matmul %138, %139, %cst_96 {dimension_numbers = #tpu.dot_dimension_numbers<[1], [0], [0], [1], [0, 0, 1, 1], [], []>} : vector<2x128xbf16>, vector<128x128xbf16>, vector<2x128xf32> -> vector<2x128xf32>
    %c0_97 = arith.constant 0 : index
    %c0_98 = arith.constant 0 : index
    %141 = vector.load %arg5[%c0_97, %c0_98] : memref<1x128xf32, #tpu.memory_space<vmem>>, vector<1x128xf32>
    %142 = vector.broadcast %141 : vector<1x128xf32> to vector<2x128xf32>
    %143 = arith.addf %140, %142 : vector<2x128xf32>
    %c0_99 = arith.constant 0 : index
    %c0_100 = arith.constant 0 : index
    %144 = vector.load %arg6[%c0_99, %c0_100] : memref<2x128xf32, #tpu.memory_space<vmem>>, vector<2x128xf32>
    tpu.vector_store %arg6[%c0_99, %c0_100], %143 {strides = array<i32>} : memref<2x128xf32, #tpu.memory_space<vmem>>, vector<2x128xf32>,
    return
  }
  func.func @transform_0(%arg0: i32) -> (i32, i32) {
    %c0_i32 = arith.constant 0 : i32
    %c0_i32_0 = arith.constant 0 : i32
    return %arg0, %c0_i32 : i32, i32
  }
  func.func @transform_1(%arg0: i32) -> (i32, i32, i32, i32) {
    %c0_i32 = arith.constant 0 : i32
    %c0_i32_0 = arith.constant 0 : i32
    %c0_i32_1 = arith.constant 0 : i32
    %c0_i32_2 = arith.constant 0 : i32
    %c0_i32_3 = arith.constant 0 : i32
    return %c0_i32, %c0_i32_0, %c0_i32_1, %c0_i32_2 : i32, i32, i32, i32
  }
  func.func @transform_2(%arg0: i32) -> (i32, i32, i32) {
    %c0_i32 = arith.constant 0 : i32
    %c0_i32_0 = arith.constant 0 : i32
    %c0_i32_1 = arith.constant 0 : i32
    %c0_i32_2 = arith.constant 0 : i32
    return %c0_i32, %c0_i32_0, %c0_i32_1 : i32, i32, i32
  }
  func.func @transform_3(%arg0: i32) -> (i32, i32) {
    %c0_i32 = arith.constant 0 : i32
    %c0_i32_0 = arith.constant 0 : i32
    %c0_i32_1 = arith.constant 0 : i32
    return %c0_i32, %c0_i32_0 : i32, i32
  }
  func.func @transform_4(%arg0: i32) -> (i32, i32) {
    %c0_i32 = arith.constant 0 : i32
    %c0_i32_0 = arith.constant 0 : i32
    %c0_i32_1 = arith.constant 0 : i32
    return %c0_i32, %c0_i32_0 : i32, i32
  }
  func.func @transform_5(%arg0: i32) -> (i32, i32) {
    %c0_i32 = arith.constant 0 : i32
    %c0_i32_0 = arith.constant 0 : i32
    return %arg0, %c0_i32 : i32, i32
  }
}

</mosaic_0001>

<bundles_post_ra>
// kernel: efficientface_temporal_forward.2
= control target key start
LH: loop header
LB: loop body
LE: loop exit
PB: predicated region body
PF: predicated region fallthrough
CT: control target
= control target key end

     0   :  { %s3260_s18 = smov 0   ;;  %s4067_s0 = inlined_call_operand.vmem [shape: bf16[8,4,9,9,3], index: 0, kind: input, shape index: {}]   ;;  %s4068_s1 = inlined_call_operand.vmem [shape: bf16[32,128], index: 1, kind: input, shape index: {}]   ;;  %s4069_s2 = inlined_call_operand.vmem [shape: f32[1,128], index: 2, kind: input, shape index: {}]   ;;  %s4070_s3 = inlined_call_operand.vmem [shape: bf16[128,128], index: 3, kind: input, shape index: {}]   ;;  %s4071_s4 = inlined_call_operand.vmem [shape: f32[1,128], index: 4, kind: input, shape index: {}]   ;;  %s4072_s5 = inlined_call_operand.vmem [shape: f32[8,1,128], index: 5, kind: output, shape index: {}]  }
   0x1 LB: > { %s2968_s19 = sadd.s32 4294967295, %s3216_s18   ;;  %p2972_p0 = scmp.ge.s32.totalorder %s3216_s18, 1  ;;  %s3216_s18 = sphi %s3260_s18, %s15_s18  }
   0x2   : > { %p187_p1 = scmp.lt.s32.totalorder %s3216_s18, 9 }
   0x4   : > { %p188_p2 = pnand %p2972_p0, %p187_p1 }
   0x5   : > { %p213_p3 = scmp.lt.s32.totalorder (!%p188_p2), %s2968_s19, 7  ;;  %s3218_s24 = smov (!%p188_p2), 3   ;;  %vm672_vm0 = vcmask (!%p188_p2), 23552   ;;  %vm697_vm1 = vcmask (!%p188_p2), 48128   ;;  %vm714_vm2 = vcmask (!%p188_p2), 72704   ;;  %vm731_vm3 = vcmask (!%p188_p2), 97280  }
   0x6   : > { %191 = sbr.rel (%p188_p2) target bundleno = 792 (0x318), region = 40  ;;  %s3219_s25 = smov (!%p188_p2), 9   ;;  %vm748_vm4 = vcmask (!%p188_p2), 121856   ;;  %vm765_vm5 = vcmask (!%p188_p2), 146432   ;;  %vm782_vm6 = vcmask (!%p188_p2), 171008   ;;  %vm799_vm7 = vcmask (!%p188_p2), 195584  }
   0x7   : > { %s3220_s26 = smov (!%p188_p2), 6   ;;  %s3221_s27 = smov (!%p188_p2), 12   ;;  %vm816_vm8 = vcmask (!%p188_p2), 220160   ;;  %vm869_vm9 = vcmask (!%p188_p2), 261120   ;;  %vm3228_vm10 = vmmov (!%p188_p2), 0   ;;  %vm1552_vm11 = vcmask (!%p188_p2), 1042434  }
   0x8   : > { %s3222_s28 = smov (!%p188_p2), 15   ;;  %s3223_s29 = smov (!%p188_p2), 18   ;;  %vm1555_vm12 = vcmask (!%p188_p2), 1043459   ;;  %vm1601_vm13 = vcmask (!%p188_p2), 1040384   ;;  %vm1602_vm14 = vsmask.f32 (!%p188_p2), 256 }
   0x9   : > { %s3224_s7 = smov (!%p188_p2), 21   ;;  %s3225_s10 = smov (!%p188_p2), 24   ;;  %vm3670_vm15 = vmand (!%p188_p2), %vm1601_vm13, %vm1602_vm14 }
   0xd   : > { %s4076_s19 = smov (!%p213_p3, %s2968_s19), 7 }
   0xe   : > { %s3129_s20 = smul.u32 288, %s4076_s19 }
  0x10   : > { %s3274_s23 = scalar_lea.vmem %s4067_s0, %s3129_s20 }
  0x11   : > { %v3277_v0 = vld [vmem:[%s3274_s23 + $0x58] ss:$0 sps:$4 sm:$0xff]   ;;  %v3151_v1 = vld [vmem:[%s3274_s23 + $0x48] ss:$0 sps:$4 sm:$0xff]   ;;  %v3283_v2 = vld [vmem:[%s3274_s23 + $0x60] ss:$0 sps:$4 sm:$0xff]  }
  0x12   : > { %301 = vrot.lane.b32.xlu1 %v3277_v0, %s3218_s24  ;;  %297 = vrot.lane.b32.xlu0 %v3151_v1, %s3218_s24  ;;  %v3287_v3 = vld [vmem:[%s3274_s23 + $0x50] ss:$0 sps:$4 sm:$0xff]   ;;  %v251_v4 = vld [vmem:[%s3274_s23 + $0x98] sm:$0xf] }
  0x13   : > { %v249_v5 = vld [vmem:[%s3274_s23 + $0x90] sm:$0xf]  ;;  %v3292_v6 = vld [vmem:[%s3274_s23 + $0x8] sm:$0xf]  ;;  %v225_v7 = vld [vmem:[%s3274_s23 + $0xc] sm:$0x1]  ;;  %v2991_v13 = vcombine.low %v251_v4, %v251_v4 }
  0x14   : > { %v3296_v8 = vld [vmem:[%s3274_s23] sm:$0xf]  ;;  %v2983_v9 = vcombine.low %v3292_v6, %v225_v7  ;;  %v223_v10 = vld [vmem:[%s3274_s23 + $0x4] sm:$0x1]  ;;  %v3301_v11 = vld [vmem:[%s3274_s23 + $0x18] sm:$0xf]  ;;  %v2990_v18 = vcombine.low %v249_v5, %v249_v5 }
  0x15   : > { %v229_v12 = vld [vmem:[%s3274_s23 + $0x1c] sm:$0x1]  ;;  %v2982_v14 = vcombine.low %v3296_v8, %v223_v10  ;;  %v3309_v16 = vld [vmem:[%s3274_s23 + $0x10] sm:$0xf]  ;;  %v227_v17 = vld [vmem:[%s3274_s23 + $0x14] sm:$0x1]  ;;  %v3014_v10 = vcombine.low %v3292_v6, %v3292_v6 }
  0x16   : > { %303 = vrot.lane.b32.xlu1 %v3283_v2, %s3218_s24  ;;  %v2985_v15 = vcombine.low %v3301_v11, %v229_v12  ;;  %299 = vrot.lane.b32.xlu0 %v3287_v3, %s3218_s24  ;;  %v361_v19 = vshrl.u32 %v2983_v9, 16  ;;  %v363_v20 = vshll.u32 %v2983_v9, 16  ;;  %v2984_v21 = vcombine.low %v3309_v16, %v227_v17  ;;  %v252_v35 = vld [vmem:[%s3274_s23 + $0x9c] sm:$0x1]  ;;  %v255_v37 = vld [vmem:[%s3274_s23 + $0xa8] sm:$0xf] }
  0x17   : > { %v354_v22 = vshrl.u32 %v2982_v14, 16  ;;  %v356_v23 = vshll.u32 %v2982_v14, 16  ;;  %v250_v38 = vld [vmem:[%s3274_s23 + $0x94] sm:$0x1]  ;;  %v253_v39 = vld [vmem:[%s3274_s23 + $0xa0] sm:$0xf]  ;;  %v3007_v40 = vcombine.low %v251_v4, %v252_v35  ;;  %v2993_v41 = vcombine.low %v255_v37, %v255_v37 }
  0x18   : > { %v377_v24 = vshll.u32 %v2985_v15, 16  ;;  %v365_v25 = vrot.slane %v363_v20, 1  ;;  %v370_v26 = vshll.u32 %v2984_v21, 16  ;;  %v375_v28 = vshrl.u32 %v2985_v15, 16  ;;  %v256_v43 = vld [vmem:[%s3274_s23 + $0xac] sm:$0x1] }
  0x19   : > { %v358_v27 = vrot.slane %v356_v23, 1  ;;  %v368_v31 = vshrl.u32 %v2984_v21, 16  ;;  %v3006_v42 = vcombine.low %v249_v5, %v250_v38  ;;  %v2992_v44 = vcombine.low %v253_v39, %v253_v39  ;;  %v254_v45 = vld [vmem:[%s3274_s23 + $0xa4] sm:$0x1]  ;;  %v3166_v47 = vld [vmem:[%s3274_s23 + $0xe0] ss:$0 sps:$4 sm:$0xff]  }
  0x1a   : > { %451 = vrot.lane.b32.xlu1 %v2991_v13, %s3219_s25  ;;  %v379_v29 = vrot.slane %v377_v24, 1  ;;  %449 = vrot.lane.b32.xlu0 %v2990_v18, %s3219_s25  ;;  %v3317_v30 = vor.u32 %v365_v25, %v361_v19  ;;  %v372_v32 = vrot.slane %v370_v26, 1  ;;  %v3009_v46 = vcombine.low %v255_v37, %v256_v43  ;;  %v3167_v50 = vld [vmem:[%s3274_s23 + $0xd8] ss:$0 sps:$4 sm:$0xff]   ;;  %v3168_v52 = vld [vmem:[%s3274_s23 + $0xf0] ss:$0 sps:$4 sm:$0xff]  }
  0x1b   : > { %v359_v33 = vor.u32 %v358_v27, %v354_v22  ;;  %v539_v48 = vshll.u32 %v3007_v40, 16  ;;  %v3008_v49 = vcombine.low %v253_v39, %v254_v45  ;;  %v532_v51 = vshll.u32 %v3006_v42, 16  ;;  %v3169_v53 = vld [vmem:[%s3274_s23 + $0xe8] ss:$0 sps:$4 sm:$0xff]   ;;  %v3355_v12 = vld [vmem:[%s3274_s23 + $0x20] sm:$0xf] }
  0x1c   : > { %v3321_v34 = vor.u32 %v379_v29, %v375_v28  ;;  %v3325_v36 = vor.u32 %v372_v32, %v368_v31  ;;  %v537_v54 = vshrl.u32 %v3007_v40, 16  ;;  %v530_v56 = vshrl.u32 %v3006_v42, 16  ;;  %v231_v15 = vld [vmem:[%s3274_s23 + $0x24] sm:$0x1]  ;;  %v3174_v18 = vld [vmem:[%s3274_s23 + $0x68] ss:$0 sps:$4 sm:$0xff]  }
  0x1d   : > { %v541_v55 = vrot.slane %v539_v48, 1  ;;  %v553_v57 = vshll.u32 %v3009_v46, 16  ;;  %v534_v58 = vrot.slane %v532_v51, 1  ;;  %v546_v59 = vshll.u32 %v3008_v49, 16  ;;  %v3200_v17 = vld [vmem:[%s4068_s1] sm:$0xff]   ;;  %v3201_v20 = vld [vmem:[%s4068_s1 + $0x8] sm:$0xff]  }
  0x1e   : > { %411 = vrot.lane.b32.xlu1 %v3317_v30, %s3220_s26  ;;  %409 = vrot.lane.b32.xlu0 %v359_v33, %s3220_s26  ;;  %v551_v61 = vshrl.u32 %v3009_v46, 16  ;;  %v544_v1 = vshrl.u32 %v3008_v49, 16  ;;  %v3015_v9 = vcombine.low %v3309_v16, %v3309_v16  ;;  %v3017_v13 = vcombine.low %v3355_v12, %v3355_v12  ;;  %v233_v22 = vld [vmem:[%s3274_s23 + $0x2c] sm:$0x1]  ;;  %v3394_v26 = vld [vmem:[%s3274_s23 + $0x38] sm:$0xf] }
  0x1f   : > { %v542_v60 = vor.u32 %v541_v55, %v537_v54  ;;  %v555_v62 = vrot.slane %v553_v57, 1  ;;  %v535_v63 = vor.u32 %v534_v58, %v530_v56  ;;  %v548_v4 = vrot.slane %v546_v59, 1  ;;  %3097 = vmatprep.subr.bf16.mxu0 %v3200_v17  ;;  %v3398_v27 = vld [vmem:[%s3274_s23 + $0x30] sm:$0xf]  ;;  %v235_v28 = vld [vmem:[%s3274_s23 + $0x34] sm:$0x1] }
  0x20   : > { %v3016_v14 = vcombine.low %v3301_v11, %v3301_v11  ;;  %v2986_v19 = vcombine.low %v3355_v12, %v231_v15  ;;  %3098 = vmatpush3.bf16.msra.mxu0 %v3200_v17  ;;  %v2988_v33 = vcombine.low %v3398_v27, %v235_v28  ;;  %v3413_v38 = vld [vmem:[%s3274_s23 + $0x78] ss:$0 sps:$4 sm:$0xff]   ;;  %v260_v49 = vld [vmem:[%s3274_s23 + $0xbc] sm:$0x1]  ;;  %v263_v51 = vld [vmem:[%s3274_s23 + $0xc8] sm:$0xf] }
  0x21   : > { %v556_v5 = vor.u32 %v555_v62, %v551_v61  ;;  %v549_v7 = vor.u32 %v548_v4, %v544_v1  ;;  %3099 = vmatprep.subr.bf16.mxu0 %v3201_v20  ;;  %v259_v46 = vld [vmem:[%s3274_s23 + $0xb8] sm:$0xf]  ;;  %v2997_v55 = vcombine.low %v263_v51, %v263_v51  ;;  %v264_v57 = vld [vmem:[%s3274_s23 + $0xcc] sm:$0x1]  ;;  %v262_v59 = vld [vmem:[%s3274_s23 + $0xc4] sm:$0x1] }
  0x22   : > { %415 = vrot.lane.b32.xlu1 %v3321_v34, %s3220_s26  ;;  %413 = vrot.lane.b32.xlu0 %v3325_v36, %s3220_s26  ;;  %v384_v21 = vshll.u32 %v2986_v19, 16  ;;  %v382_v23 = vshrl.u32 %v2986_v19, 16  ;;  %v398_v39 = vshll.u32 %v2988_v33, 16  ;;  %v396_v43 = vshrl.u32 %v2988_v33, 16  ;;  %v3190_v61 = vld [vmem:[%s3274_s23 + $0x100] ss:$0 sps:$4 sm:$0xff]  }
  0x23   : > { %v2995_v48 = vcombine.low %v259_v46, %v259_v46  ;;  %v3011_v54 = vcombine.low %v259_v46, %v260_v49  ;;  %v3191_v1 = vld [vmem:[%s3274_s23 + $0xf8] ss:$0 sps:$4 sm:$0xff]   ;;  %v3020_v33 = vcombine.low %v3394_v26, %v3394_v26 }
  0x24   : > { %3100 = vmatpush3.bf16.msra.mxu0 %v3201_v20  ;;  %v386_v24 = vrot.slane %v384_v21, 1 }
  0x25   : > { %v567_v62 = vshll.u32 %v3011_v54, 16 }
  0x26   : > { %455 = vrot.lane.b32.xlu1 %v2993_v41, %s3219_s25  ;;  %453 = vrot.lane.b32.xlu0 %v2992_v44, %s3219_s25  ;;  %v387_v29 = vor.u32 %v386_v24, %v382_v23  ;;  %v400_v44 = vrot.slane %v398_v39, 1 }
  0x28   : > { %v3426_v45 = vor.u32 %v400_v44, %v396_v43 }
  0x2a   : > { %491 = vrot.lane.b32.xlu1 %v3166_v47, %s3221_s27  ;;  %489 = vrot.lane.b32.xlu0 %v3167_v50, %s3221_s27  ;;  %v257_v47 = vld [vmem:[%s3274_s23 + $0xb0] sm:$0xf] }
  0x2b   : > { %v2994_v50 = vcombine.low %v257_v47, %v257_v47 }
  0x2e   : > { %495 = vrot.lane.b32.xlu1 %v3168_v52, %s3221_s27  ;;  %493 = vrot.lane.b32.xlu0 %v3169_v53, %s3221_s27  ;;  %v258_v52 = vld [vmem:[%s3274_s23 + $0xb4] sm:$0x1]  ;;  %v261_v53 = vld [vmem:[%s3274_s23 + $0xc0] sm:$0xf] }
  0x2f   : > { %v3010_v56 = vcombine.low %v257_v47, %v258_v52  ;;  %v2996_v58 = vcombine.low %v261_v53, %v261_v53 }
  0x31   : > { %v560_v4 = vshll.u32 %v3010_v56, 16 }
  0x32   : > { %587 = vrot.lane.b32.xlu1 %v542_v60, %s3222_s28  ;;  %585 = vrot.lane.b32.xlu0 %v535_v63, %s3222_s28  ;;  %v3013_v60 = vcombine.low %v263_v51, %v264_v57  ;;  %v3012_v63 = vcombine.low %v261_v53, %v262_v59 }
  0x33   : > { %v562_v15 = vrot.slane %v560_v4, 1 }
  0x34   : > { %v574_v17 = vshll.u32 %v3012_v63, 16  ;;  %v579_v19 = vshrl.u32 %v3013_v60, 16 }
  0x36   : > { %591 = vrot.lane.b32.xlu1 %v556_v5, %s3222_s28  ;;  %589 = vrot.lane.b32.xlu0 %v549_v7, %s3222_s28  ;;  %v3192_v5 = vld [vmem:[%s3274_s23 + $0x110] ss:$0 sps:$4 sm:$0xff]   ;;  %v565_v7 = vshrl.u32 %v3011_v54, 16  ;;  %v576_v23 = vrot.slane %v574_v17, 1 }
  0x3a   : > { %613 = vrot.lane.b32.xlu1 %v3015_v9, %s3223_s29  ;;  %611 = vrot.lane.b32.xlu0 %v3014_v10, %s3223_s29  ;;  %v569_v9 = vrot.slane %v567_v62, 1  ;;  %v581_v10 = vshll.u32 %v3013_v60, 16 }
  0x3c   : > { %v583_v20 = vrot.slane %v581_v10, 1 }
  0x3e   : > { %617 = vrot.lane.b32.xlu1 %v3017_v13, %s3223_s29  ;;  %615 = vrot.lane.b32.xlu0 %v3016_v14, %s3223_s29  ;;  %v3193_v13 = vld [vmem:[%s3274_s23 + $0x108] ss:$0 sps:$4 sm:$0xff]   ;;  %v558_v14 = vshrl.u32 %v3010_v56, 16  ;;  %v584_v24 = vor.u32 %v583_v20, %v579_v19 }
  0x40   : > { %v563_v21 = vor.u32 %v562_v15, %v558_v14 }
  0x42   : > { %632 = vrot.lane.b32.xlu1 %v3277_v0, %s3224_s7  ;;  %630 = vrot.lane.b32.xlu0 %v3287_v3, %s3224_s7  ;;  %v3382_v0 = vld [vmem:[%s3274_s23 + $0x28] sm:$0xf]  ;;  %v3388_v3 = vld [vmem:[%s3274_s23 + $0x70] ss:$0 sps:$4 sm:$0xff]  }
  0x43   : > { %v2987_v25 = vcombine.low %v3382_v0, %v233_v22  ;;  %v572_v22 = vshrl.u32 %v3012_v63, 16  ;;  %v3018_v28 = vcombine.low %v3382_v0, %v3382_v0 }
  0x45   : > { %v391_v31 = vshll.u32 %v2987_v25, 16  ;;  %v389_v35 = vshrl.u32 %v2987_v25, 16  ;;  %v577_v25 = vor.u32 %v576_v23, %v572_v22 }
  0x46   : > { %636 = vrot.lane.b32.xlu1 %v3174_v18, %s3224_s7  ;;  %634 = vrot.lane.b32.xlu0 %v3283_v2, %s3224_s7  ;;  %v237_v2 = vld [vmem:[%s3274_s23 + $0x3c] sm:$0x1] }
  0x47   : > { %v2989_v32 = vcombine.low %v3394_v26, %v237_v2  ;;  %v3019_v2 = vcombine.low %v3398_v27, %v3398_v27 }
  0x49   : > { %v405_v37 = vshll.u32 %v2989_v32, 16  ;;  %v403_v41 = vshrl.u32 %v2989_v32, 16  ;;  %v239_v32 = vld [vmem:[%s3274_s23 + $0x44] sm:$0x1] }
  0x4a   : > { %658 = vrot.lane.b32.xlu1 %v3325_v36, %s3225_s10  ;;  %656 = vrot.lane.b32.xlu0 %v3317_v30, %s3225_s10  ;;  %v3408_v30 = vld [vmem:[%s3274_s23 + $0x80] ss:$0 sps:$4 sm:$0xff]   ;;  %v393_v36 = vrot.slane %v391_v31, 1 }
  0x4b   : > { %v407_v42 = vrot.slane %v405_v37, 1 }
  0x4c   : > { %v3417_v40 = vor.u32 %v393_v36, %v389_v35  ;;  %v3199_v36 = vld [vmem:[%s3274_s23 + $0x88] ss:$0 sps:$4 sm:$0xff]  }
  0x4e   : > { %307 = vrot.lane.b32.xlu1 %v3388_v3, %s3218_s24  ;;  %305 = vrot.lane.b32.xlu0 %v3174_v18, %s3218_s24  ;;  %v570_v18 = vor.u32 %v569_v9, %v565_v7 }
  0x52   : > { %662 = vrot.lane.b32.xlu1 %v387_v29, %s3225_s10  ;;  %660 = vrot.lane.b32.xlu0 %v3321_v34, %s3225_s10  ;;  %v3423_v34 = vor.u32 %v407_v42, %v403_v41 }
  0x56   : > { %311 = vrot.lane.b32.xlu1 %v3408_v30, %s3218_s24  ;;  %309 = vrot.lane.b32.xlu0 %v3413_v38, %s3218_s24 }
  0x5a   : > { %419 = vrot.lane.b32.xlu1 %v3417_v40, %s3220_s26  ;;  %417 = vrot.lane.b32.xlu0 %v387_v29, %s3220_s26  ;;  %v238_v29 = vld [vmem:[%s3274_s23 + $0x40] sm:$0xf] }
  0x5b   : > { %v3021_v31 = vcombine.low %v238_v29, %v238_v29  ;;  %v3023_v35 = vcombine.low %v238_v29, %v239_v32 }
  0x5d   : > { %v652_v37 = vshll.u32 %v3023_v35, 16  ;;  %v650_v42 = vshrl.u32 %v3023_v35, 16 }
  0x5e   : > { %423 = vrot.lane.b32.xlu1 %v3423_v34, %s3220_s26  ;;  %421 = vrot.lane.b32.xlu0 %v3426_v45, %s3220_s26 }
  0x5f   : > { %v654_v43 = vrot.slane %v652_v37, 1 }
  0x62   : > { %459 = vrot.lane.b32.xlu1 %v2995_v48, %s3219_s25  ;;  %457 = vrot.lane.b32.xlu0 %v2994_v50, %s3219_s25 }
  0x66   : > { %463 = vrot.lane.b32.xlu1 %v2997_v55, %s3219_s25  ;;  %461 = vrot.lane.b32.xlu0 %v2996_v58, %s3219_s25 }
  0x6a   : > { %499 = vrot.lane.b32.xlu1 %v3190_v61, %s3221_s27  ;;  %497 = vrot.lane.b32.xlu0 %v3191_v1, %s3221_s27 }
  0x6e   : > { %503 = vrot.lane.b32.xlu1 %v3192_v5, %s3221_s27  ;;  %501 = vrot.lane.b32.xlu0 %v3193_v13, %s3221_s27 }
  0x72   : > { %595 = vrot.lane.b32.xlu1 %v570_v18, %s3222_s28  ;;  %593 = vrot.lane.b32.xlu0 %v563_v21, %s3222_s28 }
  0x76   : > { %599 = vrot.lane.b32.xlu1 %v584_v24, %s3222_s28  ;;  %597 = vrot.lane.b32.xlu0 %v577_v25, %s3222_s28 }
  0x7a   : > { %621 = vrot.lane.b32.xlu1 %v3019_v2, %s3223_s29  ;;  %619 = vrot.lane.b32.xlu0 %v3018_v28, %s3223_s29 }
  0x7e   : > { %625 = vrot.lane.b32.xlu1 %v3021_v31, %s3223_s29  ;;  %623 = vrot.lane.b32.xlu0 %v3020_v33, %s3223_s29 }
  0x82   : > { %640 = vrot.lane.b32.xlu1 %v3413_v38, %s3224_s7  ;;  %638 = vrot.lane.b32.xlu0 %v3388_v3, %s3224_s7  ;;  %v655_v38 = vor.u32 %v654_v43, %v650_v42 }
  0x84   : > { %v3473_v39 = vpop.permute.xlu1 %301  ;;  %v298_v41 = vpop.permute.xlu0 %297 }
  0x85   : > { %v675_v1 = vsel %vm672_vm0, %v3296_v8, %v298_v41  ;;  %v681_v29 = vsel %vm672_vm0, %v3309_v16, %v3473_v39 }
  0x86   : > { %644 = vrot.lane.b32.xlu1 %v3199_v36, %s3224_s7  ;;  %642 = vrot.lane.b32.xlu0 %v3408_v30, %s3224_s7 }
  0x88   : > { %v304_v44 = vpop.permute.xlu1 %303  ;;  %v300_v46 = vpop.permute.xlu0 %299 }
  0x89   : > { %v684_v25 = vsel %vm672_vm0, %v3301_v11, %v304_v44 }
  0x8a   : > { %666 = vrot.lane.b32.xlu1 %v3426_v45, %s3225_s10  ;;  %664 = vrot.lane.b32.xlu0 %v3417_v40, %s3225_s10 }
  0x8c   : > { %v452_v3 = vpop.permute.xlu1 %451  ;;  %v450_v47 = vpop.permute.xlu0 %449 }
  0x8e   : > { %670 = vrot.lane.b32.xlu1 %v655_v38, %s3225_s10  ;;  %668 = vrot.lane.b32.xlu0 %v3423_v34, %s3225_s10  ;;  %v678_v34 = vsel %vm672_vm0, %v3292_v6, %v300_v46  ;;  %s220_s10 = scalar_lea.vmem %s4072_s5, %s4076_s19 }
  0x90   : > { %v412_v48 = vpop.permute.xlu1 %411  ;;  %v410_v49 = vpop.permute.xlu0 %409 }
  0x91   : > { %v701_v4 = vsel %vm697_vm1, %v678_v34, %v412_v48  ;;  %v699_v7 = vsel %vm697_vm1, %v675_v1, %v410_v49 }
  0x92   : > { %v718_v9 = vsel %vm714_vm2, %v701_v4, %v452_v3  ;;  %v716_v6 = vsel %vm714_vm2, %v699_v7, %v450_v47 }
  0x94   : > { %v416_v50 = vpop.permute.xlu1 %415  ;;  %v414_v30 = vpop.permute.xlu0 %413 }
  0x95   : > { %v705_v31 = vsel %vm697_vm1, %v684_v25, %v416_v50  ;;  %v703_v33 = vsel %vm697_vm1, %v681_v29, %v414_v30 }
  0x98   : > { %v456_v51 = vpop.permute.xlu1 %455  ;;  %v454_v52 = vpop.permute.xlu0 %453 }
  0x99   : > { %v722_v35 = vsel %vm714_vm2, %v705_v31, %v456_v51  ;;  %v720_v11 = vsel %vm714_vm2, %v703_v33, %v454_v52 }
  0x9c   : > { %v492_v53 = vpop.permute.xlu1 %491  ;;  %v490_v54 = vpop.permute.xlu0 %489 }
  0x9d   : > { %v735_v13 = vsel %vm731_vm3, %v718_v9, %v492_v53  ;;  %v733_v8 = vsel %vm731_vm3, %v716_v6, %v490_v54 }
  0xa0   : > { %v496_v45 = vpop.permute.xlu1 %495  ;;  %v494_v55 = vpop.permute.xlu0 %493 }
  0xa1   : > { %v739_v41 = vsel %vm731_vm3, %v722_v35, %v496_v45  ;;  %v737_v43 = vsel %vm731_vm3, %v720_v11, %v494_v55 }
  0xa4   : > { %v588_v56 = vpop.permute.xlu1 %587  ;;  %v586_v57 = vpop.permute.xlu0 %585 }
  0xa5   : > { %v752_v15 = vsel %vm748_vm4, %v735_v13, %v588_v56  ;;  %v750_v17 = vsel %vm748_vm4, %v733_v8, %v586_v57 }
  0xa8   : > { %v592_v40 = vpop.permute.xlu1 %591  ;;  %v590_v58 = vpop.permute.xlu0 %589 }
  0xa9   : > { %v756_v16 = vsel %vm748_vm4, %v739_v41, %v592_v40  ;;  %v754_v39 = vsel %vm748_vm4, %v737_v43, %v590_v58 }
  0xac   : > { %v614_v59 = vpop.permute.xlu1 %613  ;;  %v612_v60 = vpop.permute.xlu0 %611 }
  0xad   : > { %v769_v18 = vsel %vm765_vm5, %v752_v15, %v614_v59  ;;  %v767_v19 = vsel %vm765_vm5, %v750_v17, %v612_v60 }
  0xb0   : > { %v618_v61 = vpop.permute.xlu1 %617  ;;  %v616_v62 = vpop.permute.xlu0 %615 }
  0xb1   : > { %v773_v44 = vsel %vm765_vm5, %v756_v16, %v618_v61  ;;  %v771_v46 = vsel %vm765_vm5, %v754_v39, %v616_v62 }
  0xb4   : > { %v633_v63 = vpop.permute.xlu1 %632  ;;  %v631_v5 = vpop.permute.xlu0 %630 }
  0xb5   : > { %v786_v20 = vsel %vm782_vm6, %v769_v18, %v633_v63  ;;  %v784_v22 = vsel %vm782_vm6, %v767_v19, %v631_v5 }
  0xb8   : > { %v637_v10 = vpop.permute.xlu1 %636  ;;  %v635_v14 = vpop.permute.xlu0 %634 }
  0xb9   : > { %v790_v38 = vsel %vm782_vm6, %v773_v44, %v637_v10  ;;  %v788_v47 = vsel %vm782_vm6, %v771_v46, %v635_v14 }
  0xbc   : > { %v659_v21 = vpop.permute.xlu1 %658  ;;  %v657_v24 = vpop.permute.xlu0 %656 }
  0xbd   : > { %v803_v23 = vsel %vm799_vm7, %v786_v20, %v659_v21  ;;  %v801_v2 = vsel %vm799_vm7, %v784_v22, %v657_v24 }
  0xbe   : > { %v819_v28 = vsel %vm816_vm8, %v803_v23, 0  ;;  %v818_v32 = vsel %vm816_vm8, %v801_v2, 0 }
  0xbf   : > { %v3025_v37 = vcombine.low %v818_v32, %v819_v28 }
  0xc0   : > { %v308_v36 = vpop.permute.xlu1 %307  ;;  %v306_v42 = vpop.permute.xlu0 %305 }
  0xc1   : > { %3101 = vmatprep.mubr.msk.bf16.mxu0 %vm869_vm9, %v3025_v37  ;;  %v690_v15 = vsel %vm672_vm0, %v3382_v0, %v308_v36  ;;  %v687_v17 = vsel %vm672_vm0, %v3355_v12, %v306_v42 }
  0xc4   : > { %v663_v3 = vpop.permute.xlu1 %662  ;;  %v661_v49 = vpop.permute.xlu0 %660 }
  0xc5   : > { %v807_v48 = vsel %vm799_vm7, %v790_v38, %v663_v3  ;;  %v805_v30 = vsel %vm799_vm7, %v788_v47, %v661_v49 }
  0xc6   : > { %v821_v50 = vsel %vm816_vm8, %v807_v48, 0  ;;  %v820_v51 = vsel %vm816_vm8, %v805_v30, 0 }
  0xc7   : > { %v3026_v52 = vcombine.low %v820_v51, %v821_v50 }
  0xc8   : > { %v312_v53 = vpop.permute.xlu1 %311  ;;  %v310_v54 = vpop.permute.xlu0 %309 }
  0xc9   : > { %3102 = vmatmul.mubr.msk.bf16.vlgmr.msra.gmra.mrb[0].mxu0 %vm869_vm9, %v3026_v52  ;;  %v696_v25 = vsel %vm672_vm0, %v3394_v26, %v312_v53  ;;  %v693_v12 = vsel %vm672_vm0, %v3398_v27, %v310_v54  ;;  %vm2325_vm0 = vcmask 1041409  }
  0xcc   : > { %v420_v45 = vpop.permute.xlu1 %419  ;;  %v418_v55 = vpop.permute.xlu0 %417 }
  0xcd   : > { %v709_v18 = vsel %vm697_vm1, %v690_v15, %v420_v45  ;;  %v707_v19 = vsel %vm697_vm1, %v687_v17, %v418_v55 }
  0xd0   : > { %v424_v56 = vpop.permute.xlu1 %423  ;;  %v422_v57 = vpop.permute.xlu0 %421 }
  0xd1   : > { %v713_v28 = vsel %vm697_vm1, %v696_v25, %v424_v56  ;;  %v711_v32 = vsel %vm697_vm1, %v693_v12, %v422_v57  ;;  %v3226_v56 = vmov 1966171168   ;;  %vm2793_vm1 = vcmask 1044484  }
  0xd2   : > { %v965_v57 = vunpack.c.l.s4 %v3226_v56 }
  0xd4   : > { %v460_v40 = vpop.permute.xlu1 %459  ;;  %v458_v58 = vpop.permute.xlu0 %457 }
  0xd5   : > { %v726_v20 = vsel %vm714_vm2, %v709_v18, %v460_v40  ;;  %v724_v22 = vsel %vm714_vm2, %v707_v19, %v458_v58  ;;  %v967_v40 = vlaneseq  ;;  %v3202_v58 = vld [vmem:[%s4070_s3] sm:$0xff]  }
  0xd8   : > { %v464_v59 = vpop.permute.xlu1 %463  ;;  %v462_v60 = vpop.permute.xlu0 %461 }
  0xd9   : > { %v730_v33 = vsel %vm714_vm2, %v713_v28, %v464_v59  ;;  %v728_v37 = vsel %vm714_vm2, %v711_v32, %v462_v60  ;;  %v3227_v59 = vmov 0.0   ;;  %v3203_v60 = vld [vmem:[%s4070_s3 + $0x8] sm:$0xff]   ;;  %vm2796_vm2 = vcmask 1045509  }
  0xda   : > { %3109 = vmatprep.subr.bf16.mxu1 %v3227_v59  ;;  %3125 = vmatprep.mubr.msk.bf16.mxu1 %vm3228_vm10, %v3227_v59  ;;  %v3207_v32 = vld [vmem:[%s4070_s3 + $0x28] sm:$0xff]  }
  0xdb   : > { %3110 = vmatpush3.bf16.msra.mxu1 %v3202_v58 }
  0xdc   : > { %v500_v61 = vpop.permute.xlu1 %499  ;;  %v498_v62 = vpop.permute.xlu0 %497  ;;  %3111 = vmatprep.subr.bf16.mxu1 %v3227_v59 }
  0xdd   : > { %v743_v23 = vsel %vm731_vm3, %v726_v20, %v500_v61  ;;  %v741_v0 = vsel %vm731_vm3, %v724_v22, %v498_v62  ;;  %v966_v61 = vunpack.c.0.s8 %v965_v57  ;;  %v968_v62 = vshrl.u32 %v967_v40, 7 }
  0xdf   : > { %3112 = vmatpush3.bf16.msra.mxu1 %v3203_v60  ;;  %v3209_v60 = vld [vmem:[%s4070_s3 + $0x38] sm:$0xff]  }
  0xe0   : > { %v504_v34 = vpop.permute.xlu1 %503  ;;  %v502_v63 = vpop.permute.xlu0 %501  ;;  %3113 = vmatprep.subr.bf16.mxu1 %v3227_v59 }
  0xe1   : > { %v747_v11 = vsel %vm731_vm3, %v730_v33, %v504_v34  ;;  %v745_v43 = vsel %vm731_vm3, %v728_v37, %v502_v63  ;;  %v3204_v34 = vld [vmem:[%s4070_s3 + $0x10] sm:$0xff]   ;;  %v3585_v63 = vld [vmem:[%s4069_s2] ss:$0 sm:$0xff]  ;;  %vm2799_vm3 = vcmask 1046534  }
  0xe3   : > { %3114 = vmatpush3.bf16.msra.mxu1 %v3204_v34 }
  0xe4   : > { %v596_v1 = vpop.permute.xlu1 %595  ;;  %v594_v4 = vpop.permute.xlu0 %593  ;;  %3115 = vmatprep.subr.bf16.mxu1 %v3227_v59 }
  0xe5   : > { %v760_v2 = vsel %vm748_vm4, %v743_v23, %v596_v1  ;;  %v758_v29 = vsel %vm748_vm4, %v741_v0, %v594_v4  ;;  %v3587_v1 = vsub.s32 %v966_v61, %v968_v62 }
  0xe8   : > { %v600_v5 = vpop.permute.xlu1 %599  ;;  %v598_v7 = vpop.permute.xlu0 %597 }
  0xe9   : > { %v764_v16 = vsel %vm748_vm4, %v747_v11, %v600_v5  ;;  %v762_v46 = vsel %vm748_vm4, %v745_v43, %v598_v7  ;;  %v3229_v5 = vmov 0   ;;  %vm2802_vm4 = vcmask 1047559  }
  0xea   : > { %v2369_v7 = vrot.slane %v3229_v5, %v3587_v1 }
  0xec   : > { %v622_v9 = vpop.permute.xlu1 %621  ;;  %v620_v10 = vpop.permute.xlu0 %619  ;;  %v2370_v18 = vcombine.high %v2369_v7, %v2369_v7  ;;  %v3604_v12 = vrot.slane %v2369_v7, %v3587_v1 }
  0xed   : > { %v777_v31 = vsel %vm765_vm5, %v760_v2, %v622_v9  ;;  %v775_v35 = vsel %vm765_vm5, %v758_v29, %v620_v10 }
  0xee   : > { %v3607_v28 = vrot.slane %v2370_v18, %v3587_v1 }
  0xf0   : > { %v626_v13 = vpop.permute.xlu1 %625  ;;  %v624_v6 = vpop.permute.xlu0 %623  ;;  %v2455_v43 = vshrl.u32 %v3607_v28, 16 }
  0xf1   : > { %v781_v38 = vsel %vm765_vm5, %v764_v16, %v626_v13  ;;  %v779_v47 = vsel %vm765_vm5, %v762_v46, %v624_v6  ;;  %v3205_v13 = vld [vmem:[%s4070_s3 + $0x18] sm:$0xff]  }
  0xf2   : > { %3116 = vmatpush3.bf16.msra.mxu1 %v3205_v13 }
  0xf3   : > { %3117 = vmatprep.subr.bf16.mxu1 %v3227_v59 }
  0xf4   : > { %v641_v14 = vpop.permute.xlu1 %640  ;;  %v639_v8 = vpop.permute.xlu0 %638 }
  0xf5   : > { %v794_v26 = vsel %vm782_vm6, %v777_v31, %v641_v14  ;;  %v792_v27 = vsel %vm782_vm6, %v775_v35, %v639_v8 }
  0xf8   : > { %v645_v21 = vpop.permute.xlu1 %644  ;;  %v643_v24 = vpop.permute.xlu0 %642 }
  0xf9   : > { %v798_v48 = vsel %vm782_vm6, %v781_v38, %v645_v21  ;;  %v796_v30 = vsel %vm782_vm6, %v779_v47, %v643_v24  ;;  %v3206_v21 = vld [vmem:[%s4070_s3 + $0x20] sm:$0xff]   ;;  %v3208_v38 = vld [vmem:[%s4070_s3 + $0x30] sm:$0xff]  }
  0xfa   : > { %3118 = vmatpush3.bf16.msra.mxu1 %v3206_v21 }
  0xfb   : > { %3119 = vmatprep.subr.bf16.mxu1 %v3227_v59 }
  0xfc   : > { %v667_v36 = vpop.permute.xlu1 %666  ;;  %v665_v42 = vpop.permute.xlu0 %664 }
  0xfd   : > { %v811_v41 = vsel %vm799_vm7, %v794_v26, %v667_v36  ;;  %v809_v44 = vsel %vm799_vm7, %v792_v27, %v665_v42  ;;  %v2452_v42 = vshrl.u32 %v3604_v12, 16 }
  0xfe   : > { %v823_v39 = vsel %vm816_vm8, %v811_v41, 0  ;;  %v822_v3 = vsel %vm816_vm8, %v809_v44, 0  ;;  %3120 = vmatpush3.bf16.msra.mxu1 %v3207_v32 }
  0xff   : > { %v3027_v49 = vcombine.low %v822_v3, %v823_v39  ;;  %3121 = vmatprep.subr.bf16.mxu1 %v3227_v59 }
 0x100   : > { %v671_v50 = vpop.permute.xlu1 %670  ;;  %v669_v52 = vpop.permute.xlu0 %668 }
 0x101   : > { %v815_v51 = vsel %vm799_vm7, %v798_v48, %v671_v50  ;;  %v813_v54 = vsel %vm799_vm7, %v796_v30, %v669_v52  ;;  %3105 = vmatprep.mubr.msk.bf16.mxu0 %vm869_vm9, %v3027_v49 }
 0x102   : > { %v825_v53 = vsel %vm816_vm8, %v815_v51, 0  ;;  %v824_v45 = vsel %vm816_vm8, %v813_v54, 0  ;;  %3122 = vmatpush3.bf16.msra.mxu1 %v3208_v38 }
 0x103   : > { %v3028_v55 = vcombine.low %v824_v45, %v825_v53  ;;  %3123 = vmatprep.subr.bf16.mxu1 %v3227_v59 }
 0x105   : > { %3106 = vmatmul.mubr.msk.bf16.gmra.mrb[4].mxu0 %vm869_vm9, %v3028_v55 }
 0x106   : > { %3124 = vmatpush3.bf16.msra.mxu1 %v3209_v60 }
 0x19c   : > { %v3103_v4 = vpop.f32.mrb[0].mxu0 }
 0x19d   : > { %v925_v9 = vadd.f32 %v3103_v4, %v3585_v63  ;;  %v916_v10 = vpop.f32.mrb[1].mxu0 }
 0x19e   : > { %v917_v6 = vadd.f32 %v3585_v63, %v916_v10  ;;  %v3104_v14 = vpop.f32.mrb[2].mxu0 }
 0x19f   : > { %v928_v8 = vadd.f32 %v3104_v14, %v3585_v63  ;;  %v919_v15 = vpop.f32.mrb[3].mxu0  ;;  %v949_v19 = vmax.f32 %v925_v9, 0.0 }
 0x1a0   : > { %v920_v17 = vadd.f32 %v3585_v63, %v919_v15  ;;  %v947_v22 = vmax.f32 %v917_v6, 0.0 }
 0x1a1   : > { %v950_v20 = vmax.f32 %v928_v8, 0.0 }
 0x1a2   : > { %v948_v23 = vmax.f32 %v920_v17, 0.0 }
 0x1a3   : > { %v956_v24 = vpack.c.bf16 %v950_v20, %v949_v19  ;;  %v3036_v25 = vpack.c.bf16 %v950_v20, %v950_v20 }
 0x1a4   : > { %v955_v0 = vpack.c.bf16 %v948_v23, %v947_v22  ;;  %v3035_v2 = vpack.c.bf16 %v948_v23, %v948_v23 }
 0x1a5   : > { %v1019_v29 = vrot.slane %v956_v24, %v3587_v1  ;;  %v1026_v31 = vrot.slane %v3036_v25, %v3587_v1 }
 0x1a6   : > { %v3615_v33 = vrot.slane %v955_v0, %v3587_v1  ;;  %v3618_v35 = vrot.slane %v3035_v2, %v3587_v1 }
 0x1a7   : > { %v1027_v26 = vcombine.high %v1019_v29, %v1019_v29  ;;  %v1028_v36 = vcombine.high %v1026_v31, %v1026_v31  ;;  %v1035_v37 = vrot.slane %v1019_v29, %v3587_v1  ;;  %v1042_v11 = vrot.slane %v1026_v31, %v3587_v1 }
 0x1a8   : > { %v978_v27 = vcombine.high %v3615_v33, %v3615_v33  ;;  %v979_v41 = vcombine.high %v3618_v35, %v3618_v35  ;;  %v3638_v48 = vrot.slane %v3615_v33, %v3587_v1  ;;  %v3642_v49 = vrot.slane %v3618_v35, %v3587_v1 }
 0x1a9   : > { %v1049_v16 = vrot.slane %v1027_v26, %v3587_v1  ;;  %v1056_v39 = vrot.slane %v1028_v36, %v3587_v1  ;;  %v1057_v44 = vcombine.high %v1035_v37, %v1035_v37  ;;  %v1058_v46 = vcombine.high %v1042_v11, %v1042_v11 }
 0x1aa   : > { %v1281_v3 = vrot.slane %v1035_v37, %v3587_v1  ;;  %v1323_v47 = vrot.slane %v1042_v11, %v3587_v1  ;;  %v1653_v52 = vshrl.u32 %v1035_v37, 16  ;;  %v1673_v58 = vshrl.u32 %v1042_v11, 16 }
 0x1ab   : > { %v1059_v50 = vcombine.high %v1049_v16, %v1049_v16  ;;  %v1295_v30 = vrot.slane %v1049_v16, %v3587_v1  ;;  %v1309_v51 = vrot.slane %v1057_v44, %v3587_v1  ;;  %v1337_v45 = vrot.slane %v1056_v39, %v3587_v1 }
 0x1ac   : > { %v1288_v53 = vrot.slane %v1281_v3, %v3587_v1  ;;  %v1330_v54 = vrot.slane %v1323_v47, %v3587_v1  ;;  %v1351_v55 = vrot.slane %v1058_v46, %v3587_v1  ;;  %v1060_v56 = vcombine.high %v1056_v39, %v1056_v39 }
 0x1ad   : > { %v1302_v57 = vrot.slane %v1295_v30, %v3587_v1  ;;  %v1316_v40 = vrot.slane %v1309_v51, %v3587_v1  ;;  %v1344_v61 = vrot.slane %v1337_v45, %v3587_v1  ;;  %v1658_v34 = vshrl.u32 %v1049_v16, 16 }
 0x1ae   : > { %v1358_v62 = vrot.slane %v1351_v55, %v3587_v1  ;;  %v1663_v4 = vshrl.u32 %v1057_v44, 16  ;;  %v1533_v5 = vunpack.c.l.b16 %v1288_v53  ;;  %v1668_v10 = vshrl.u32 %v1059_v50, 16 }
 0x1af   : > { %v1534_v7 = vunpack.c.l.b16 %v1302_v57  ;;  %v1535_v9 = vunpack.c.l.b16 %v1316_v40  ;;  %v1536_v13 = vunpack.c.l.b16 %v1330_v54  ;;  %v1537_v6 = vunpack.c.l.b16 %v1344_v61 }
 0x1b0   : > { %v1538_v14 = vunpack.c.l.b16 %v1358_v62  ;;  %v1678_v8 = vshrl.u32 %v1056_v39, 16  ;;  %v1683_v18 = vshrl.u32 %v1058_v46, 16  ;;  %v1688_v19 = vshrl.u32 %v1060_v56, 16 }
 0x1b1   : > { %v1561_v15 = vrot.slane %v1534_v7, 7  ;;  %v1563_v17 = vrot.slane %v1535_v9, 6  ;;  %v1565_v20 = vrot.slane %v1537_v6, 7  ;;  %v1812_v22 = vmax.bf16 %v1653_v52, %v1035_v37 }
 0x1b2   : > { %v1567_v21 = vrot.slane %v1538_v14, 6  ;;  %v3659_v23 = vmax.bf16 %v1658_v34, %v1049_v16  ;;  %v3662_v24 = vmax.bf16 %v1663_v4, %v1057_v44  ;;  %v3664_v25 = vmax.bf16 %v1668_v10, %v1059_v50 }
 0x1b3   : > { %v1562_v59 = vsel %vm1552_vm11, %v1561_v15, %v1533_v5  ;;  %v1816_v0 = vmax.bf16 %v1673_v58, %v1042_v11  ;;  %v1566_v29 = vsel %vm1552_vm11, %v1565_v20, %v1536_v13  ;;  %v1817_v32 = vmax.bf16 %v1678_v8, %v1056_v39 }
 0x1b4   : > { %v1564_v2 = vsel %vm1555_vm12, %v1563_v17, %v1562_v59  ;;  %v3675_v33 = vrot.slane %v978_v27, %v3587_v1  ;;  %v1568_v26 = vsel %vm1555_vm12, %v1567_v21, %v1566_v29  ;;  %v3682_v37 = vrot.slane %v979_v41, %v3587_v1 }
 0x1b5   : > { %v1587_v36 = vpack.c.b16 %v1564_v2, %v1564_v2  ;;  %v3686_v11 = vcombine.high %v3638_v48, %v3638_v48  ;;  %v1588_v16 = vpack.c.b16 %v1568_v26, %v1568_v26  ;;  %v3688_v44 = vmax.bf16 %v1683_v18, %v1058_v46 }
 0x1b6   : > { %v3692_v27 = vcombine.high %v3642_v49, %v3642_v49  ;;  %v1197_v39 = vrot.slane %v3638_v48, %v3587_v1  ;;  %v3698_v35 = vmax.bf16 %v1688_v19, %v1060_v56  ;;  %v1211_v41 = vrot.slane %v3675_v33, %v3587_v1 }
 0x1b7   : > { %v1606_v38 = vsel %vm3670_vm15, 0, %v1587_v36  ;;  %v1225_v3 = vrot.slane %v3686_v11, %v3587_v1  ;;  %v1607_v46 = vsel %vm3670_vm15, 0, %v1588_v16  ;;  %v1239_v30 = vrot.slane %v3642_v49, %v3587_v1 }
 0x1b8   : > { %v3707_v47 = vrot.slane %v1606_v38, %v3587_v1  ;;  %v1204_v50 = vrot.slane %v1197_v39, %v3587_v1  ;;  %v3713_v51 = vrot.slane %v1607_v46, %v3587_v1  ;;  %v1218_v52 = vrot.slane %v1211_v41, %v3587_v1 }
 0x1b9   : > { %v1232_v53 = vrot.slane %v1225_v3, %v3587_v1  ;;  %v1253_v54 = vrot.slane %v3682_v37, %v3587_v1  ;;  %v1010_v55 = vcombine.high %v3675_v33, %v3675_v33  ;;  %v1011_v56 = vcombine.high %v3682_v37, %v3682_v37 }
 0x1ba   : > { %v1902_v45 = vrot.slane %v3707_v47, %v3587_v1  ;;  %v1267_v57 = vrot.slane %v3692_v27, %v3587_v1  ;;  %v1895_v40 = vcombine.high %v3707_v47, %v3707_v47  ;;  %v1924_v58 = vrot.slane %v3713_v51, %v3587_v1 }
 0x1bb   : > { %v1246_v60 = vrot.slane %v1239_v30, %v3587_v1  ;;  %v1260_v61 = vrot.slane %v1253_v54, %v3587_v1  ;;  %v1917_v62 = vcombine.high %v3713_v51, %v3713_v51  ;;  %v1528_v5 = vunpack.c.l.b16 %v1218_v52 }
 0x1bc   : > { %v2108_v34 = vmax.bf16 %v1902_v45, %v1812_v22  ;;  %v1274_v4 = vrot.slane %v1267_v57, %v3587_v1  ;;  %v2039_v7 = vshrl.u32 %v1924_v58, 16  ;;  %v2112_v9 = vmax.bf16 %v1924_v58, %v1816_v0 }
 0x1bd   : > { %v1527_v10 = vunpack.c.l.b16 %v1204_v50  ;;  %v1529_v13 = vunpack.c.l.b16 %v1232_v53  ;;  %v2033_v6 = vshrl.u32 %v1902_v45, 16  ;;  %v1531_v14 = vunpack.c.l.b16 %v1260_v61 }
 0x1be   : > { %v1532_v8 = vunpack.c.l.b16 %v1274_v4  ;;  %v1551_v15 = vrot.slane %v1528_v5, 7  ;;  %v3736_v17 = vmax.bf16 %v2039_v7, %v1817_v32  ;;  %v2206_v18 = vrot.slane %v2112_v9, %v3587_v1 }
 0x1bf   : > { %v3739_v19 = vmax.bf16 %v2112_v9, %v2108_v34  ;;  %v1554_v20 = vrot.slane %v1529_v13, 6  ;;  %v1530_v21 = vunpack.c.l.b16 %v1246_v60  ;;  %v1557_v59 = vrot.slane %v1531_v14, 7 }
 0x1c0   : > { %v1553_v22 = vsel %vm1552_vm11, %v1551_v15, %v1527_v10  ;;  %v1559_v2 = vrot.slane %v1532_v8, 6  ;;  %v2213_v0 = vrot.slane %v2206_v18, %v3587_v1  ;;  %v2220_v29 = vrot.slane %v3736_v17, %v3587_v1 }
 0x1c1   : > { %v1556_v26 = vsel %vm1555_vm12, %v1554_v20, %v1553_v22  ;;  %v1613_v32 = vshrl.u32 %v3638_v48, 16  ;;  %v1558_v36 = vsel %vm1552_vm11, %v1557_v59, %v1530_v21  ;;  %v1618_v39 = vshrl.u32 %v3675_v33, 16 }
 0x1c2   : > { %v1585_v16 = vpack.c.b16 %v1556_v26, %v1556_v26  ;;  %v1623_v38 = vshrl.u32 %v3686_v11, 16  ;;  %v2227_v41 = vrot.slane %v2220_v29, %v3587_v1  ;;  %v1560_v3 = vsel %vm1555_vm12, %v1559_v2, %v1558_v36 }
 0x1c3   : > { %v1628_v46 = vshrl.u32 %v1010_v55, 16  ;;  %v1633_v47 = vshrl.u32 %v3642_v49, 16  ;;  %v3754_v50 = vmax.bf16 %v2033_v6, %v3659_v23  ;;  %v2316_v30 = vunpack.c.l.b16 %v2213_v0 }
 0x1c4   : > { %v1586_v51 = vpack.c.b16 %v1560_v3, %v1560_v3  ;;  %v1638_v52 = vshrl.u32 %v3682_v37, 16  ;;  %v2317_v53 = vunpack.c.l.b16 %v2227_v41  ;;  %v1604_v54 = vsel %vm3670_vm15, 0, %v1585_v16 }
 0x1c5   : > { %v1643_v45 = vshrl.u32 %v3692_v27, 16  ;;  %v1648_v57 = vshrl.u32 %v1011_v56, 16  ;;  %v1804_v60 = vmax.bf16 %v1613_v32, %v3638_v48  ;;  %v1805_v61 = vmax.bf16 %v1618_v39, %v3675_v33 }
 0x1c6   : > { %v1605_v58 = vsel %vm3670_vm15, 0, %v1586_v51  ;;  %v1806_v23 = vmax.bf16 %v1623_v38, %v3686_v11  ;;  %v2331_v34 = vrot.slane %v2317_v53, 7  ;;  %v1807_v4 = vmax.bf16 %v1628_v46, %v1010_v55 }
 0x1c7   : > { %v1808_v5 = vmax.bf16 %v1633_v47, %v3642_v49  ;;  %v1809_v7 = vmax.bf16 %v1638_v52, %v3682_v37  ;;  %v1850_v9 = vrot.slane %v1604_v54, %v3587_v1  ;;  %v1872_v10 = vrot.slane %v1605_v58, %v3587_v1 }
 0x1c8   : > { %v1909_v13 = vrot.slane %v1895_v40, %v3587_v1  ;;  %v1931_v6 = vrot.slane %v1917_v62, %v3587_v1  ;;  %v1810_v48 = vmax.bf16 %v1643_v45, %v3692_v27  ;;  %v1811_v14 = vmax.bf16 %v1648_v57, %v1011_v56 }
 0x1c9   : > { %v3773_v33 = vsel %vm2325_vm0, %v2331_v34, %v2316_v30  ;;  %v2351_v11 = vmax.bf16 %v3736_v17, %v3754_v50  ;;  %v1851_v49 = vcombine.high %v1850_v9, %v1850_v9  ;;  %v1858_v37 = vrot.slane %v1850_v9, %v3587_v1 }
 0x1ca   : > { %v1873_v55 = vcombine.high %v1872_v10, %v1872_v10  ;;  %v1880_v8 = vrot.slane %v1872_v10, %v3587_v1  ;;  %v2036_v15 = vshrl.u32 %v1909_v13, 16  ;;  %v2042_v18 = vshrl.u32 %v1931_v6, 16 }
 0x1cb   : > { %v2110_v40 = vmax.bf16 %v1909_v13, %v3662_v24  ;;  %v2114_v62 = vmax.bf16 %v1931_v6, %v3688_v44  ;;  %v1865_v27 = vrot.slane %v1851_v49, %v3587_v1  ;;  %v2021_v20 = vshrl.u32 %v1858_v37, 16 }
 0x1cc   : > { %v1887_v56 = vrot.slane %v1873_v55, %v3587_v1  ;;  %v2027_v21 = vshrl.u32 %v1880_v8, 16  ;;  %v2100_v22 = vmax.bf16 %v1858_v37, %v1804_v60  ;;  %v2104_v59 = vmax.bf16 %v1880_v8, %v1808_v5 }
 0x1cd   : > { %v3784_v2 = vmax.bf16 %v2036_v15, %v3664_v25  ;;  %v3787_v0 = vmax.bf16 %v2042_v18, %v3698_v35  ;;  %v2024_v29 = vshrl.u32 %v1865_v27, 16  ;;  %v2101_v32 = vmax.bf16 %v2021_v20, %v1805_v61 }
 0x1ce   : > { %v2030_v26 = vshrl.u32 %v1887_v56, 16  ;;  %v2102_v24 = vmax.bf16 %v1865_v27, %v1806_v23  ;;  %v2105_v36 = vmax.bf16 %v2027_v21, %v1809_v7  ;;  %v2106_v44 = vmax.bf16 %v1887_v56, %v1810_v48 }
 0x1cf   : > { %v2150_v16 = vrot.slane %v2104_v59, %v3587_v1  ;;  %v2346_v39 = vmax.bf16 %v2104_v59, %v2100_v22  ;;  %v2103_v38 = vmax.bf16 %v2024_v29, %v1807_v4  ;;  %v2234_v3 = vrot.slane %v2114_v62, %v3587_v1 }
 0x1d0   : > { %v2107_v41 = vmax.bf16 %v2030_v26, %v1811_v14  ;;  %v2248_v25 = vrot.slane %v3787_v0, %v3587_v1  ;;  %v2164_v35 = vrot.slane %v2105_v36, %v3587_v1  ;;  %v2178_v47 = vrot.slane %v2106_v44, %v3587_v1 }
 0x1d1   : > { %v2157_v46 = vrot.slane %v2150_v16, %v3587_v1  ;;  %v2347_v30 = vmax.bf16 %v2105_v36, %v2101_v32  ;;  %v2348_v52 = vmax.bf16 %v2106_v44, %v2102_v24  ;;  %v2491_v54 = vmax.bf16 %v3604_v12, %v2346_v39 }
 0x1d2   : > { %v2192_v51 = vrot.slane %v2107_v41, %v3587_v1  ;;  %v2349_v53 = vmax.bf16 %v2107_v41, %v2103_v38  ;;  %v2171_v45 = vrot.slane %v2164_v35, %v3587_v1  ;;  %v2185_v57 = vrot.slane %v2178_v47, %v3587_v1 }
 0x1d3   : > { %v2312_v58 = vunpack.c.l.b16 %v2157_v46  ;;  %v2492_v60 = vmax.bf16 %v2452_v42, %v2347_v30  ;;  %v2493_v23 = vmax.bf16 %v3607_v28, %v2348_v52  ;;  %v2552_v34 = vrot.slane %v2491_v54, %v3587_v1 }
 0x1d4   : > { %v2199_v61 = vrot.slane %v2192_v51, %v3587_v1  ;;  %v2241_v4 = vrot.slane %v2234_v3, %v3587_v1  ;;  %v2313_v5 = vunpack.c.l.b16 %v2171_v45  ;;  %v2314_v7 = vunpack.c.l.b16 %v2185_v57 }
 0x1d5   : > { %v2566_v9 = vrot.slane %v2492_v60, %v3587_v1  ;;  %v2255_v10 = vrot.slane %v2248_v25, %v3587_v1  ;;  %v3808_v48 = vmax.bf16 %v2114_v62, %v2110_v40  ;;  %v2353_v12 = vmax.bf16 %v3787_v0, %v3784_v2 }
 0x1d6   : > { %v2315_v13 = vunpack.c.l.b16 %v2199_v61  ;;  %v2318_v6 = vunpack.c.l.b16 %v2241_v4  ;;  %v2324_v42 = vrot.slane %v2313_v5, 7  ;;  %v2327_v14 = vrot.slane %v2314_v7, 6 }
 0x1d7   : > { %v2319_v49 = vunpack.c.l.b16 %v2255_v10  ;;  %v2494_v37 = vmax.bf16 %v2455_v43, %v2349_v53  ;;  %v2559_v18 = vrot.slane %v2552_v34, %v3587_v1  ;;  %v2580_v20 = vrot.slane %v2493_v23, %v3587_v1 }
 0x1d8   : > { %v2329_v55 = vrot.slane %v2315_v13, 5  ;;  %v3107_v8 = vpop.f32.mrb[4].mxu0  ;;  %v2333_v15 = vrot.slane %v2318_v6, 6  ;;  %v2326_v40 = vsel %vm2325_vm0, %v2324_v42, %v2312_v58  ;;  %v3827_v36 = vrot.slane %v2566_v9, %v3587_v1 }
 0x1d9   : > { %v941_v27 = vadd.f32 %v3107_v8, %v3585_v63  ;;  %v932_v56 = vpop.f32.mrb[5].mxu0  ;;  %v2335_v62 = vrot.slane %v2319_v49, 5  ;;  %v2328_v59 = vsel %vm1552_vm11, %v2327_v14, %v2326_v40  ;;  %v2594_v43 = vrot.slane %v2494_v37, %v3587_v1 }
 0x1da   : > { %v933_v21 = vadd.f32 %v3585_v63, %v932_v56  ;;  %v3108_v22 = vpop.f32.mrb[6].mxu0  ;;  %v2334_v28 = vsel %vm1552_vm11, %v2333_v15, %v3773_v33  ;;  %v2330_v32 = vsel %vm1555_vm12, %v2329_v55, %v2328_v59  ;;  %v2587_v33 = vrot.slane %v2580_v20, %v3587_v1 }
 0x1db   : > { %v944_v29 = vadd.f32 %v3108_v22, %v3585_v63  ;;  %v935_v26 = vpop.f32.mrb[7].mxu0  ;;  %v2336_v24 = vsel %vm1555_vm12, %v2335_v62, %v2334_v28  ;;  %v953_v44 = vmax.f32 %v941_v27, 0.0  ;;  %v2343_v39 = vpack.c.b16 %v2330_v32, %v2330_v32 }
 0x1dc   : > { %v936_v16 = vadd.f32 %v3585_v63, %v935_v26  ;;  %v2344_v38 = vpack.c.b16 %v2336_v24, %v2336_v24  ;;  %v951_v41 = vmax.f32 %v933_v21, 0.0  ;;  %v3832_v25 = vrot.slane %v2594_v43, %v3587_v1 }
 0x1dd   : > { %v954_v3 = vmax.f32 %v944_v29, 0.0  ;;  %v2391_v35 = vrot.slane %v2343_v39, %v3587_v1  ;;  %v3838_v30 = vunpack.c.l.b16 %v2559_v18  ;;  %v2771_v63 = vunpack.c.l.b16 %v3827_v36 }
 0x1de   : > { %v952_v46 = vmax.f32 %v936_v16, 0.0  ;;  %v3836_v47 = vrot.slane %v2344_v38, %v3587_v1  ;;  %v3841_v53 = vunpack.c.l.b16 %v2587_v33 }
 0x1df   : > { %v958_v51 = vpack.c.bf16 %v954_v3, %v953_v44  ;;  %v3038_v52 = vpack.c.bf16 %v954_v3, %v954_v3  ;;  %v2392_v57 = vcombine.high %v2391_v35, %v2391_v35  ;;  %v3844_v58 = vrot.slane %v2391_v35, %v3587_v1 }
 0x1e0   : > { %v957_v54 = vpack.c.bf16 %v952_v46, %v951_v41  ;;  %v3037_v45 = vpack.c.bf16 %v952_v46, %v952_v46  ;;  %v2414_v23 = vcombine.high %v3836_v47, %v3836_v47  ;;  %v3852_v34 = vrot.slane %v3836_v47, %v3587_v1 }
 0x1e1   : > { %v1117_v60 = vrot.slane %v958_v51, %v3587_v1  ;;  %v1124_v61 = vrot.slane %v3038_v52, %v3587_v1  ;;  %v3857_v7 = vrot.slane %v2392_v57, %v3587_v1  ;;  %v2458_v9 = vshrl.u32 %v3844_v58, 16 }
 0x1e2   : > { %v1068_v4 = vrot.slane %v957_v54, %v3587_v1  ;;  %v1075_v5 = vrot.slane %v3037_v45, %v3587_v1 }
 0x1e3   : > { %v1125_v10 = vcombine.high %v1117_v60, %v1117_v60  ;;  %v1126_v13 = vcombine.high %v1124_v61, %v1124_v61  ;;  %v1133_v6 = vrot.slane %v1117_v60, %v3587_v1  ;;  %v1140_v42 = vrot.slane %v1124_v61, %v3587_v1 }
 0x1e4   : > { %v1076_v14 = vcombine.high %v1068_v4, %v1068_v4  ;;  %v1077_v49 = vcombine.high %v1075_v5, %v1075_v5  ;;  %v3863_v37 = vrot.slane %v1068_v4, %v3587_v1  ;;  %v3866_v55 = vrot.slane %v1075_v5, %v3587_v1 }
 0x1e5   : > { %v1147_v8 = vrot.slane %v1125_v10, %v3587_v1  ;;  %v1154_v15 = vrot.slane %v1126_v13, %v3587_v1  ;;  %v1155_v18 = vcombine.high %v1133_v6, %v1133_v6  ;;  %v1156_v27 = vcombine.high %v1140_v42, %v1140_v42 }
 0x1e6   : > { %v1449_v56 = vrot.slane %v1133_v6, %v3587_v1  ;;  %v1491_v40 = vrot.slane %v1140_v42, %v3587_v1  ;;  %v1733_v62 = vshrl.u32 %v1133_v6, 16  ;;  %v1753_v20 = vshrl.u32 %v1140_v42, 16 }
 0x1e7   : > { %v1157_v21 = vcombine.high %v1147_v8, %v1147_v8  ;;  %v1158_v22 = vcombine.high %v1154_v15, %v1154_v15  ;;  %v1463_v59 = vrot.slane %v1147_v8, %v3587_v1  ;;  %v1477_v28 = vrot.slane %v1155_v18, %v3587_v1 }
 0x1e8   : > { %v1456_v43 = vrot.slane %v1449_v56, %v3587_v1  ;;  %v1498_v29 = vrot.slane %v1491_v40, %v3587_v1  ;;  %v1505_v26 = vrot.slane %v1154_v15, %v3587_v1  ;;  %v1519_v32 = vrot.slane %v1156_v27, %v3587_v1 }
 0x1e9   : > { %v1470_v24 = vrot.slane %v1463_v59, %v3587_v1  ;;  %v1484_v44 = vrot.slane %v1477_v28, %v3587_v1  ;;  %v1738_v16 = vshrl.u32 %v1147_v8, 16  ;;  %v1743_v39 = vshrl.u32 %v1155_v18, 16 }
 0x1ea   : > { %v1512_v38 = vrot.slane %v1505_v26, %v3587_v1  ;;  %v1526_v41 = vrot.slane %v1519_v32, %v3587_v1  ;;  %v1545_v3 = vunpack.c.l.b16 %v1456_v43  ;;  %v1548_v33 = vunpack.c.l.b16 %v1498_v29 }
 0x1eb   : > { %v1546_v46 = vunpack.c.l.b16 %v1470_v24  ;;  %v1547_v35 = vunpack.c.l.b16 %v1484_v44  ;;  %v1748_v51 = vshrl.u32 %v1157_v21, 16  ;;  %v1758_v52 = vshrl.u32 %v1154_v15, 16 }
 0x1ec   : > { %v1549_v54 = vunpack.c.l.b16 %v1512_v38  ;;  %v1550_v45 = vunpack.c.l.b16 %v1526_v41  ;;  %v1763_v57 = vshrl.u32 %v1156_v27, 16  ;;  %v1768_v60 = vshrl.u32 %v1158_v22, 16 }
 0x1ed   : > { %v1577_v61 = vrot.slane %v1546_v46, 7  ;;  %v1579_v4 = vrot.slane %v1547_v35, 6  ;;  %v1828_v5 = vmax.bf16 %v1733_v62, %v1133_v6  ;;  %v1829_v10 = vmax.bf16 %v1738_v16, %v1147_v8 }
 0x1ee   : > { %v1581_v13 = vrot.slane %v1549_v54, 7  ;;  %v1583_v56 = vrot.slane %v1550_v45, 6  ;;  %v3882_v40 = vmax.bf16 %v1743_v39, %v1155_v18  ;;  %v3884_v59 = vmax.bf16 %v1748_v51, %v1157_v21 }
 0x1ef   : > { %v1578_v28 = vsel %vm1552_vm11, %v1577_v61, %v1545_v3  ;;  %v1832_v43 = vmax.bf16 %v1753_v20, %v1140_v42  ;;  %v1833_v29 = vmax.bf16 %v1758_v52, %v1154_v15  ;;  %v3887_v26 = vmax.bf16 %v1763_v57, %v1156_v27 }
 0x1f0   : > { %v1580_v32 = vsel %vm1555_vm12, %v1579_v4, %v1578_v28  ;;  %v1582_v24 = vsel %vm1552_vm11, %v1581_v13, %v1548_v33  ;;  %v3891_v44 = vmax.bf16 %v1768_v60, %v1158_v22  ;;  %v1098_v6 = vrot.slane %v1076_v14, %v3587_v1 }
 0x1f1   : > { %v1584_v8 = vsel %vm1555_vm12, %v1583_v56, %v1582_v24  ;;  %v1591_v18 = vpack.c.b16 %v1580_v32, %v1580_v32  ;;  %v3896_v62 = vrot.slane %v1077_v49, %v3587_v1  ;;  %v1106_v42 = vcombine.high %v3863_v37, %v3863_v37 }
 0x1f2   : > { %v1592_v15 = vpack.c.b16 %v1584_v8, %v1584_v8  ;;  %v1107_v27 = vcombine.high %v3866_v55, %v3866_v55  ;;  %v1108_v20 = vcombine.high %v1098_v6, %v1098_v6  ;;  %v1365_v21 = vrot.slane %v3863_v37, %v3587_v1 }
 0x1f3   : > { %v1610_v14 = vsel %vm3670_vm15, 0, %v1591_v18  ;;  %v1109_v22 = vcombine.high %v3896_v62, %v3896_v62  ;;  %v1379_v49 = vrot.slane %v1098_v6, %v3587_v1  ;;  %v1393_v16 = vrot.slane %v1106_v42, %v3587_v1 }
 0x1f4   : > { %v1611_v39 = vsel %vm3670_vm15, 0, %v1592_v15  ;;  %v1982_v38 = vrot.slane %v1610_v14, %v3587_v1  ;;  %v1372_v41 = vrot.slane %v1365_v21, %v3587_v1  ;;  %v1407_v3 = vrot.slane %v3866_v55, %v3587_v1 }
 0x1f5   : > { %v2004_v33 = vrot.slane %v1611_v39, %v3587_v1  ;;  %v1386_v46 = vrot.slane %v1379_v49, %v3587_v1  ;;  %v1400_v35 = vrot.slane %v1393_v16, %v3587_v1  ;;  %v1421_v51 = vrot.slane %v3896_v62, %v3587_v1 }
 0x1f6   : > { %v1983_v52 = vcombine.high %v1982_v38, %v1982_v38  ;;  %v1990_v54 = vrot.slane %v1982_v38, %v3587_v1  ;;  %v1414_v45 = vrot.slane %v1407_v3, %v3587_v1  ;;  %v1435_v57 = vrot.slane %v1107_v27, %v3587_v1 }
 0x1f7   : > { %v2005_v60 = vcombine.high %v2004_v33, %v2004_v33  ;;  %v2012_v61 = vrot.slane %v2004_v33, %v3587_v1  ;;  %v1428_v4 = vrot.slane %v1421_v51, %v3587_v1  ;;  %v1539_v13 = vunpack.c.l.b16 %v1372_v41 }
 0x1f8   : > { %v2057_v56 = vshrl.u32 %v1990_v54, 16  ;;  %v2124_v28 = vmax.bf16 %v1990_v54, %v1828_v5  ;;  %v1442_v32 = vrot.slane %v1435_v57, %v3587_v1  ;;  %v1540_v24 = vunpack.c.l.b16 %v1386_v46 }
 0x1f9   : > { %v2063_v8 = vshrl.u32 %v2012_v61, 16  ;;  %v2128_v18 = vmax.bf16 %v2012_v61, %v1832_v43  ;;  %v1541_v15 = vunpack.c.l.b16 %v1400_v35  ;;  %v1542_v21 = vunpack.c.l.b16 %v1414_v45 }
 0x1fa   : > { %v3927_v14 = vmax.bf16 %v2057_v56, %v1829_v10  ;;  %v1543_v49 = vunpack.c.l.b16 %v1428_v4  ;;  %v1544_v16 = vunpack.c.l.b16 %v1442_v32  ;;  %v1569_v39 = vrot.slane %v1540_v24, 7 }
 0x1fb   : > { %v3929_v38 = vmax.bf16 %v2063_v8, %v1833_v29  ;;  %v3931_v3 = vmax.bf16 %v2128_v18, %v2124_v28  ;;  %v1571_v33 = vrot.slane %v1541_v15, 6  ;;  %v1693_v41 = vshrl.u32 %v3863_v37, 16 }
 0x1fc   : > { %v1570_v5 = vsel %vm1552_vm11, %v1569_v39, %v1539_v13  ;;  %v1573_v51 = vrot.slane %v1543_v49, 7  ;;  %v1575_v46 = vrot.slane %v1544_v16, 6  ;;  %v1698_v54 = vshrl.u32 %v1098_v6, 16 }
 0x1fd   : > { %v1572_v43 = vsel %vm1555_vm12, %v1571_v33, %v1570_v5  ;;  %v1703_v35 = vshrl.u32 %v1106_v42, 16  ;;  %v1708_v10 = vshrl.u32 %v1108_v20, 16  ;;  %v1713_v45 = vshrl.u32 %v3866_v55, 16 }
 0x1fe   : > { %v1574_v57 = vsel %vm1552_vm11, %v1573_v51, %v1542_v21  ;;  %v1589_v29 = vpack.c.b16 %v1572_v43, %v1572_v43  ;;  %v1718_v61 = vshrl.u32 %v3896_v62, 16  ;;  %v1723_v4 = vshrl.u32 %v1107_v27, 16 }
 0x1ff   : > { %v1576_v56 = vsel %vm1555_vm12, %v1575_v46, %v1574_v57  ;;  %v1728_v28 = vshrl.u32 %v1109_v22, 16  ;;  %v1820_v13 = vmax.bf16 %v1693_v41, %v3863_v37  ;;  %v1821_v32 = vmax.bf16 %v1698_v54, %v1098_v6 }
 0x200   : > { %v1590_v24 = vpack.c.b16 %v1576_v56, %v1576_v56  ;;  %v1608_v8 = vsel %vm3670_vm15, 0, %v1589_v29  ;;  %v1822_v18 = vmax.bf16 %v1703_v35, %v1106_v42  ;;  %v1823_v15 = vmax.bf16 %v1708_v10, %v1108_v20 }
 0x201   : > { %v1824_v49 = vmax.bf16 %v1713_v45, %v3866_v55  ;;  %v1825_v21 = vmax.bf16 %v1718_v61, %v3896_v62  ;;  %v1826_v16 = vmax.bf16 %v1723_v4, %v1107_v27  ;;  %v1827_v39 = vmax.bf16 %v1728_v28, %v1109_v22 }
 0x202   : > { %v1609_v33 = vsel %vm3670_vm15, 0, %v1590_v24  ;;  %v1938_v5 = vrot.slane %v1608_v8, %v3587_v1  ;;  %v1997_v37 = vrot.slane %v1983_v52, %v3587_v1  ;;  %v2019_v6 = vrot.slane %v2005_v60, %v3587_v1 }
 0x203   : > { %v1960_v41 = vrot.slane %v1609_v33, %v3587_v1  ;;  %v2359_v42 = vmax.bf16 %v3929_v38, %v3927_v14  ;;  %v3957_v55 = vrot.slane %v2414_v23, %v3587_v1  ;;  %v2461_v31 = vshrl.u32 %v3857_v7, 16 }
 0x204   : > { %v1939_v62 = vcombine.high %v1938_v5, %v1938_v5  ;;  %v1946_v27 = vrot.slane %v1938_v5, %v3587_v1  ;;  %v2060_v20 = vshrl.u32 %v1997_v37, 16  ;;  %v2066_v22 = vshrl.u32 %v2019_v6, 16 }
 0x205   : > { %v1961_v52 = vcombine.high %v1960_v41, %v1960_v41  ;;  %v1968_v60 = vrot.slane %v1960_v41, %v3587_v1  ;;  %v2126_v51 = vmax.bf16 %v1997_v37, %v3882_v40  ;;  %v2130_v46 = vmax.bf16 %v2019_v6, %v3887_v26 }
 0x206   : > { %v1953_v54 = vrot.slane %v1939_v62, %v3587_v1  ;;  %v2045_v43 = vshrl.u32 %v1946_v27, 16  ;;  %v2116_v47 = vmax.bf16 %v1946_v27, %v1820_v13  ;;  %v3966_v23 = vmax.bf16 %v2060_v20, %v3884_v59 }
 0x207   : > { %v1975_v35 = vrot.slane %v1961_v52, %v3587_v1  ;;  %v2051_v10 = vshrl.u32 %v1968_v60, 16  ;;  %v2120_v45 = vmax.bf16 %v1968_v60, %v1824_v49  ;;  %v3970_v57 = vmax.bf16 %v2066_v22, %v3891_v44 }
 0x208   : > { %v2048_v29 = vshrl.u32 %v1953_v54, 16  ;;  %v2117_v61 = vmax.bf16 %v2045_v43, %v1821_v32  ;;  %v2118_v4 = vmax.bf16 %v1953_v54, %v1822_v18  ;;  %v3972_v40 = vmax.bf16 %v2130_v46, %v2126_v51 }
 0x209   : > { %v2054_v26 = vshrl.u32 %v1975_v35, 16  ;;  %v2121_v56 = vmax.bf16 %v2051_v10, %v1825_v21  ;;  %v2122_v28 = vmax.bf16 %v1975_v35, %v1826_v16  ;;  %v2262_v13 = vrot.slane %v2120_v45, %v3587_v1 }
 0x20a   : > { %v2119_v24 = vmax.bf16 %v2048_v29, %v1823_v15  ;;  %v2354_v59 = vmax.bf16 %v2120_v45, %v2116_v47  ;;  %v2361_v8 = vmax.bf16 %v3970_v57, %v3966_v23  ;;  %v2464_v49 = vshrl.u32 %v3852_v34, 16 }
 0x20b   : > { %v2123_v33 = vmax.bf16 %v2054_v26, %v1827_v39  ;;  %v2269_v44 = vrot.slane %v2262_v13, %v3587_v1  ;;  %v2276_v32 = vrot.slane %v2121_v56, %v3587_v1  ;;  %v2290_v18 = vrot.slane %v2122_v28, %v3587_v1 }
 0x20c   : > { %v2355_v5 = vmax.bf16 %v2121_v56, %v2117_v61  ;;  %v2356_v37 = vmax.bf16 %v2122_v28, %v2118_v4  ;;  %v2467_v21 = vshrl.u32 %v3957_v55, 16  ;;  %v2495_v15 = vmax.bf16 %v3844_v58, %v3739_v19 }
 0x20d   : > { %v2283_v16 = vrot.slane %v2276_v32, %v3587_v1  ;;  %v2297_v6 = vrot.slane %v2290_v18, %v3587_v1  ;;  %v2304_v41 = vrot.slane %v2123_v33, %v3587_v1  ;;  %v2320_v39 = vunpack.c.l.b16 %v2269_v44 }
 0x20e   : > { %v2357_v62 = vmax.bf16 %v2123_v33, %v2119_v24  ;;  %v2496_v27 = vmax.bf16 %v2458_v9, %v2351_v11  ;;  %v2497_v20 = vmax.bf16 %v3857_v7, %v3808_v48  ;;  %v2498_v19 = vmax.bf16 %v2461_v31, %v2353_v12 }
 0x20f   : > { %v2311_v22 = vrot.slane %v2304_v41, %v3587_v1  ;;  %v2321_v52 = vunpack.c.l.b16 %v2283_v16  ;;  %v2322_v60 = vunpack.c.l.b16 %v2297_v6  ;;  %v2499_v51 = vmax.bf16 %v3852_v34, %v2354_v59 }
 0x210   : > { %v2500_v46 = vmax.bf16 %v2464_v49, %v2355_v5  ;;  %v2501_v54 = vmax.bf16 %v3957_v55, %v2356_v37  ;;  %v2502_v17 = vmax.bf16 %v2467_v21, %v2357_v62  ;;  %v2608_v50 = vrot.slane %v2495_v15, %v3587_v1 }
 0x211   : > { %v2323_v11 = vunpack.c.l.b16 %v2311_v22  ;;  %v2337_v58 = vrot.slane %v2321_v52, 7  ;;  %v2339_v9 = vrot.slane %v2322_v60, 6  ;;  %v2622_v48 = vrot.slane %v2496_v27, %v3587_v1 }
 0x212   : > { %v2615_v2 = vrot.slane %v2608_v50, %v3587_v1  ;;  %v2636_v0 = vrot.slane %v2497_v20, %v3587_v1  ;;  %v2650_v12 = vrot.slane %v2498_v19, %v3587_v1  ;;  %v2664_v7 = vrot.slane %v2499_v51, %v3587_v1 }
 0x213   : > { %v2341_v34 = vrot.slane %v2323_v11, 5  ;;  %v2338_v55 = vsel %vm2325_vm0, %v2337_v58, %v2320_v39  ;;  %v2629_v31 = vrot.slane %v2622_v48, %v3587_v1  ;;  %v2678_v43 = vrot.slane %v2500_v46, %v3587_v1 }
 0x214   : > { %v2340_v47 = vsel %vm1552_vm11, %v2339_v9, %v2338_v55  ;;  %v2643_v35 = vrot.slane %v2636_v0, %v3587_v1  ;;  %v2657_v10 = vrot.slane %v2650_v12, %v3587_v1  ;;  %v2773_v45 = vunpack.c.l.b16 %v3832_v25 }
 0x215   : > { %v2342_v29 = vsel %vm1555_vm12, %v2341_v34, %v2340_v47  ;;  %v2685_v61 = vrot.slane %v2678_v43, %v3587_v1  ;;  %v2692_v4 = vrot.slane %v2501_v54, %v3587_v1  ;;  %v2706_v26 = vrot.slane %v2502_v17, %v3587_v1 }
 0x216   : > { %v2345_v56 = vpack.c.b16 %v2342_v29, %v2342_v29  ;;  %v2671_v28 = vrot.slane %v2664_v7, %v3587_v1  ;;  %v2774_v13 = vunpack.c.l.b16 %v2615_v2  ;;  %v2775_v24 = vunpack.c.l.b16 %v2629_v31 }
 0x217   : > { %v2699_v59 = vrot.slane %v2692_v4, %v3587_v1  ;;  %v2713_v49 = vrot.slane %v2706_v26, %v3587_v1  ;;  %v2776_v25 = vunpack.c.l.b16 %v2643_v35  ;;  %v2777_v33 = vunpack.c.l.b16 %v2657_v10 }
 0x218   : > { %v2435_v44 = vrot.slane %v2345_v56, %v3587_v1  ;;  %v2779_v32 = vunpack.c.l.b16 %v2685_v61  ;;  %v2786_v18 = vrot.slane %v2771_v63, 7  ;;  %v2788_v5 = vrot.slane %v3841_v53, 6 }
 0x219   : > { %v2780_v37 = vunpack.c.l.b16 %v2699_v59  ;;  %v2781_v21 = vunpack.c.l.b16 %v2713_v49  ;;  %v2790_v15 = vrot.slane %v2773_v45, 5  ;;  %v2792_v16 = vrot.slane %v2774_v13, 4 }
 0x21a   : > { %v2436_v6 = vcombine.high %v2435_v44, %v2435_v44  ;;  %v2443_v41 = vrot.slane %v2435_v44, %v3587_v1  ;;  %v2778_v39 = vunpack.c.l.b16 %v2671_v28  ;;  %v2787_v62 = vsel %vm2325_vm0, %v2786_v18, %v3838_v30 }
 0x21b   : > { %v2789_v27 = vsel %vm1552_vm11, %v2788_v5, %v2787_v62  ;;  %v2795_v20 = vrot.slane %v2775_v24, 3  ;;  %v2798_v19 = vrot.slane %v2776_v25, 2  ;;  %v2804_v22 = vrot.slane %v2779_v32, 7 }
 0x21c   : > { %v2450_v36 = vrot.slane %v2436_v6, %v3587_v1  ;;  %v2470_v63 = vshrl.u32 %v2443_v41, 16  ;;  %v2503_v53 = vmax.bf16 %v2443_v41, %v3931_v3  ;;  %v2791_v52 = vsel %vm1555_vm12, %v2790_v15, %v2789_v27 }
 0x21d   : > { %v2794_v60 = vsel %vm2793_vm1, %v2792_v16, %v2791_v52  ;;  %v2805_v51 = vsel %vm2325_vm0, %v2804_v22, %v2778_v39  ;;  %v2806_v46 = vrot.slane %v2780_v37, 6  ;;  %v2808_v54 = vrot.slane %v2781_v21, 5 }
 0x21e   : > { %v2473_v17 = vshrl.u32 %v2450_v36, 16  ;;  %v2504_v30 = vmax.bf16 %v2470_v63, %v2359_v42  ;;  %v2505_v50 = vmax.bf16 %v2450_v36, %v3972_v40  ;;  %v2720_v11 = vrot.slane %v2503_v53, %v3587_v1 }
 0x21f   : > { %v2797_v58 = vsel %vm2796_vm2, %v2795_v20, %v2794_v60  ;;  %v2801_v3 = vrot.slane %v2777_v33, 1  ;;  %v2807_v9 = vsel %vm1552_vm11, %v2806_v46, %v2805_v51 }
 0x220   : > { %v2506_v48 = vmax.bf16 %v2473_v17, %v2361_v8  ;;  %v2727_v2 = vrot.slane %v2720_v11, %v3587_v1  ;;  %v2734_v0 = vrot.slane %v2504_v30, %v3587_v1  ;;  %v2748_v14 = vrot.slane %v2505_v50, %v3587_v1 }
 0x221   : > { %v2800_v38 = vsel %vm2799_vm3, %v2798_v19, %v2797_v58  ;;  %v2809_v42 = vsel %vm1555_vm12, %v2808_v54, %v2807_v9 }
 0x222   : > { %v2741_v40 = vrot.slane %v2734_v0, %v3587_v1  ;;  %v2755_v12 = vrot.slane %v2748_v14, %v3587_v1  ;;  %v2762_v7 = vrot.slane %v2506_v48, %v3587_v1  ;;  %v2782_v34 = vunpack.c.l.b16 %v2727_v2 }
 0x223   : > { %v2803_v23 = vsel %vm2802_vm4, %v2801_v3, %v2800_v38 }
 0x224   : > { %v2769_v57 = vrot.slane %v2762_v7, %v3587_v1  ;;  %v2783_v8 = vunpack.c.l.b16 %v2741_v40  ;;  %v2784_v55 = vunpack.c.l.b16 %v2755_v12  ;;  %v2810_v31 = vrot.slane %v2782_v34, 4  ;;  %v3071_v1 = vld [vmem:[%s4071_s4] ss:$0 sm:$0xff] }
 0x226   : > { %v2785_v43 = vunpack.c.l.b16 %v2769_v57  ;;  %v2811_v47 = vsel %vm2793_vm1, %v2810_v31, %v2809_v42  ;;  %v2812_v35 = vrot.slane %v2783_v8, 3  ;;  %v2814_v10 = vrot.slane %v2784_v55, 2 }
 0x228   : > { %v2813_v45 = vsel %vm2796_vm2, %v2812_v35, %v2811_v47  ;;  %v2816_v29 = vrot.slane %v2785_v43, 1 }
 0x229   : > { %v2815_v61 = vsel %vm2799_vm3, %v2814_v10, %v2813_v45 }
 0x22a   : > { %v2817_v4 = vsel %vm2802_vm4, %v2816_v29, %v2815_v61 }
 0x22b   : > { %v2818_v26 = vpack.c.b16 %v2817_v4, %v2803_v23 }
 0x22d   : > { %3126 = vmatmul.mubr.bf16.vlgmr.msra.gmra.mrb[0].mxu1 %v2818_v26 }
 0x300   : > { %v2902_v56 = vpop.f32.mrb[0].mxu1 }
 0x301   : > { %v2903_v28 = vadd.f32 %v3071_v1, %v2902_v56  ;;  %v3127_v13 = vpop.f32.mrb[1].mxu1 }
 0x302   : > { %v2905_v24 = vpop.f32.mrb[2].mxu1 }
 0x303   : > { %v2906_v59 = vadd.f32 %v3071_v1, %v2905_v24  ;;  %v3128_v49 = vpop.f32.mrb[3].mxu1  ;;  %v2909_v25 = vmax.f32 %v2903_v28, 0.0 }
 0x305   : > { %v2910_v33 = vmax.f32 %v2906_v59, 0.0 }
 0x307   : > { %v2911_v44 = vadd.f32 %v2910_v33, %v2909_v25 }
 0x309   : > { %v2912_v32 = vrot.slane %v2911_v44, 4 }
 0x30b   : > { %v2913_v18 = vadd.f32 %v2912_v32, %v2911_v44 }
 0x30d   : > { %v2914_v5 = vrot.slane %v2913_v18, 2 }
 0x30f   : > { %v2915_v37 = vadd.f32 %v2914_v5, %v2913_v18 }
 0x311   : > { %v2916_v21 = vrot.slane %v2915_v37, 1 }
 0x313   : > { %v2917_v15 = vadd.f32 %v2916_v21, %v2915_v37 }
 0x315   : > { %v2919_v16 = vmul.f32 0.0625, %v2917_v15 }
 0x317   : > { %2920 = vst [vmem:[%s220_s10] sm:$0x1] %v2919_v16 }
 0x318 PF: > { %s15_s18 = sadd.s32 1, %s3216_s18  }
 0x319   : > { %p12_p4 = scmp.ge.s32.totalorder %s15_s18, 10  }
 0x31b   :  { %14 = sbr.rel (!%p12_p4) target bundleno = 1 (0x1), region = 70 }

// kernel: efficientface_temporal_forward.3
= control target key start
LH: loop header
LB: loop body
LE: loop exit
PB: predicated region body
PF: predicated region fallthrough
CT: control target
= control target key end

     0   :  { %v2318_v1 = vmov 0.0   ;;  %vm2319_vm0 = vmmov 0   ;;  %s2847_s0 = inlined_call_operand.vmem [shape: f32[8,128], index: 0, kind: input, shape index: {}]   ;;  %s2848_s1 = inlined_call_operand.vmem [shape: bf16[4,3,128,128], index: 1, kind: input, shape index: {}]   ;;  %s2849_s2 = inlined_call_operand.vmem [shape: f32[4,1,128], index: 2, kind: input, shape index: {}]   ;;  %s2850_s3 = inlined_call_operand.vmem [shape: bf16[128,128], index: 3, kind: input, shape index: {}]   ;;  %s2851_s4 = inlined_call_operand.vmem [shape: f32[1,128], index: 4, kind: input, shape index: {}]   ;;  %s2852_s5 = inlined_call_operand.hbm [shape: f32[2,128], index: 5, kind: output, shape index: {}]  }
   0x1   :  { %v2190_v0 = vld [vmem:[%s2848_s1] sm:$0xff]   ;;  %1927 = vmatprep.subr.bf16.mxu0 %v2318_v1  ;;  %1947 = vmatprep.subr.bf16.mxu1 %v2318_v1  ;;  %v2191_v2 = vld [vmem:[%s2848_s1 + $0x8] sm:$0xff]   ;;  %v2192_v3 = vld [vmem:[%s2848_s1 + $0x10] sm:$0xff]  }
   0x2   :  { %1928 = vmatpush3.bf16.msra.mxu0 %v2190_v0  ;;  %1943 = vmatprep.mubr.msk.bf16.mxu0 %vm2319_vm0, %v2318_v1  ;;  %v2198_v4 = vld [vmem:[%s2848_s1 + $0x80] sm:$0xff]   ;;  %v2193_v5 = vld [vmem:[%s2848_s1 + $0x18] sm:$0xff]   ;;  %v2199_v6 = vld [vmem:[%s2848_s1 + $0x88] sm:$0xff]  }
   0x3   :  { %1929 = vmatprep.subr.bf16.mxu0 %v2318_v1  ;;  %1963 = vmatprep.mubr.msk.bf16.mxu1 %vm2319_vm0, %v2318_v1  ;;  %v2194_v7 = vld [vmem:[%s2848_s1 + $0x20] sm:$0xff]   ;;  %v2201_v8 = vld [vmem:[%s2848_s1 + $0x90] sm:$0xff]   ;;  %v2195_v9 = vld [vmem:[%s2848_s1 + $0x28] sm:$0xff]  }
   0x4   :  { %1948 = vmatpush3.bf16.msra.mxu1 %v2198_v4  ;;  %v2203_v10 = vld [vmem:[%s2848_s1 + $0x98] sm:$0xff]   ;;  %v2196_v11 = vld [vmem:[%s2848_s1 + $0x30] sm:$0xff]   ;;  %v2205_v12 = vld [vmem:[%s2848_s1 + $0xa0] sm:$0xff]  }
   0x5   :  { %1949 = vmatprep.subr.bf16.mxu1 %v2318_v1  ;;  %v2197_v13 = vld [vmem:[%s2848_s1 + $0x38] sm:$0xff]   ;;  %v38_v14 = vld [vmem:[%s2847_s0] sm:$0xff]  ;;  %v2207_v15 = vld [vmem:[%s2848_s1 + $0xa8] sm:$0xff]  }
   0x6   :  { %1930 = vmatpush3.bf16.msra.mxu0 %v2191_v2  ;;  %v2200_v16 = vld [vmem:[%s2848_s1 + $0x40] sm:$0xff]   ;;  %v2209_v17 = vld [vmem:[%s2848_s1 + $0xb0] sm:$0xff]   ;;  %v39_v18 = vpack.c.bf16 %v38_v14, %v38_v14  ;;  %v2202_v19 = vld [vmem:[%s2848_s1 + $0x48] sm:$0xff]  }
   0x7   :  { %1931 = vmatprep.subr.bf16.mxu0 %v2318_v1  ;;  %v2211_v20 = vld [vmem:[%s2848_s1 + $0xb8] sm:$0xff]   ;;  %v2204_v21 = vld [vmem:[%s2848_s1 + $0x50] sm:$0xff]   ;;  %v2208_v23 = vld [vmem:[%s2848_s1 + $0x60] sm:$0xff]  }
   0x8   :  { %1950 = vmatpush3.bf16.msra.mxu1 %v2199_v6  ;;  %v2206_v22 = vld [vmem:[%s2848_s1 + $0x58] sm:$0xff]   ;;  %v2210_v24 = vld [vmem:[%s2848_s1 + $0x68] sm:$0xff]   ;;  %v2212_v25 = vld [vmem:[%s2848_s1 + $0x70] sm:$0xff]  }
   0x9   :  { %1951 = vmatprep.subr.bf16.mxu1 %v2318_v1  ;;  %v2213_v26 = vld [vmem:[%s2848_s1 + $0x78] sm:$0xff]  }
   0xa   :  { %1932 = vmatpush3.bf16.msra.mxu0 %v2192_v3 }
   0xb   :  { %1933 = vmatprep.subr.bf16.mxu0 %v2318_v1 }
   0xc   :  { %1952 = vmatpush3.bf16.msra.mxu1 %v2201_v8 }
   0xd   :  { %1953 = vmatprep.subr.bf16.mxu1 %v2318_v1 }
   0xe   :  { %1934 = vmatpush3.bf16.msra.mxu0 %v2193_v5 }
   0xf   :  { %1935 = vmatprep.subr.bf16.mxu0 %v2318_v1 }
  0x10   :  { %1954 = vmatpush3.bf16.msra.mxu1 %v2203_v10 }
  0x11   :  { %1955 = vmatprep.subr.bf16.mxu1 %v2318_v1 }
  0x12   :  { %1936 = vmatpush3.bf16.msra.mxu0 %v2194_v7 }
  0x13   :  { %1937 = vmatprep.subr.bf16.mxu0 %v2318_v1 }
  0x14   :  { %1956 = vmatpush3.bf16.msra.mxu1 %v2205_v12 }
  0x15   :  { %1957 = vmatprep.subr.bf16.mxu1 %v2318_v1 }
  0x16   :  { %1938 = vmatpush3.bf16.msra.mxu0 %v2195_v9 }
  0x17   :  { %1939 = vmatprep.subr.bf16.mxu0 %v2318_v1 }
  0x18   :  { %1958 = vmatpush3.bf16.msra.mxu1 %v2207_v15 }
  0x19   :  { %1959 = vmatprep.subr.bf16.mxu1 %v2318_v1 }
  0x1a   :  { %1940 = vmatpush3.bf16.msra.mxu0 %v2196_v11 }
  0x1b   :  { %1941 = vmatprep.subr.bf16.mxu0 %v2318_v1 }
  0x1c   :  { %1960 = vmatpush3.bf16.msra.mxu1 %v2209_v17 }
  0x1d   :  { %1961 = vmatprep.subr.bf16.mxu1 %v2318_v1 }
  0x1e   :  { %1942 = vmatpush3.bf16.msra.mxu0 %v2197_v13 }
  0x1f   :  { %1967 = vmatprep.subr.bf16.mxu0 %v2318_v1 }
  0x20   :  { %1962 = vmatpush3.bf16.msra.mxu1 %v2211_v20 }
  0x21   :  { %1944 = vmatmul.mubr.bf16.vlgmr.msra.gmra.mrb[0].mxu0 %v39_v18  ;;  %1987 = vmatprep.subr.bf16.mxu1 %v2318_v1 }
  0x22   :  { %1968 = vmatpush3.bf16.msra.mxu0 %v2200_v16  ;;  %1983 = vmatprep.mubr.msk.bf16.mxu0 %vm2319_vm0, %v2318_v1 }
  0x23   :  { %1969 = vmatprep.subr.bf16.mxu0 %v2318_v1  ;;  %1964 = vmatmul.mubr.bf16.vlgmr.msra.gmra.mrb[0].mxu1 %v39_v18 }
  0x24   :  { %2003 = vmatprep.mubr.msk.bf16.mxu1 %vm2319_vm0, %v2318_v1 }
  0x26   :  { %1970 = vmatpush3.bf16.msra.mxu0 %v2202_v19 }
  0x27   :  { %1971 = vmatprep.subr.bf16.mxu0 %v2318_v1 }
  0x2a   :  { %1972 = vmatpush3.bf16.msra.mxu0 %v2204_v21 }
  0x2b   :  { %1973 = vmatprep.subr.bf16.mxu0 %v2318_v1 }
  0x2e   :  { %1974 = vmatpush3.bf16.msra.mxu0 %v2206_v22 }
  0x2f   :  { %1975 = vmatprep.subr.bf16.mxu0 %v2318_v1 }
  0x32   :  { %1976 = vmatpush3.bf16.msra.mxu0 %v2208_v23 }
  0x33   :  { %1977 = vmatprep.subr.bf16.mxu0 %v2318_v1 }
  0x36   :  { %1978 = vmatpush3.bf16.msra.mxu0 %v2210_v24 }
  0x37   :  { %1979 = vmatprep.subr.bf16.mxu0 %v2318_v1 }
  0x3a   :  { %1980 = vmatpush3.bf16.msra.mxu0 %v2212_v25 }
  0x3b   :  { %1981 = vmatprep.subr.bf16.mxu0 %v2318_v1 }
  0x3e   :  { %1982 = vmatpush3.bf16.msra.mxu0 %v2213_v26 }
  0x3f   :  { %2007 = vmatprep.subr.bf16.mxu0 %v2318_v1 }
  0x41   :  { %1984 = vmatmul.mubr.bf16.vlgmr.msra.gmra.mrb[4].mxu0 %v39_v18 }
  0x42   :  { %2023 = vmatprep.mubr.msk.bf16.mxu0 %vm2319_vm0, %v2318_v1 }
  0x43   :  { %10 = vsyncpa [#allocation3], 0  ;;  %v2214_v27 = vld [vmem:[%s2848_s1 + $0xc0] sm:$0xff]   ;;  %v2216_v29 = vld [vmem:[%s2848_s1 + $0xc8] sm:$0xff]   ;;  %v22_v51 = vlaneseq  ;;  %vm1368_vm3 = vcmask 1043456   ;;  %vm1415_vm4 = vcmask 1041409  }
  0x44   :  { %v2215_v28 = vld [vmem:[%s2848_s1 + $0x140] sm:$0xff]   ;;  %1988 = vmatpush3.bf16.msra.mxu1 %v2214_v27  ;;  %v2217_v30 = vld [vmem:[%s2848_s1 + $0x148] sm:$0xff]   ;;  %v2218_v31 = vld [vmem:[%s2848_s1 + $0xd0] sm:$0xff]   ;;  %s2320_s27 = smov [#allocation2]  }
  0x45   :  { %2008 = vmatpush3.bf16.msra.mxu0 %v2215_v28  ;;  %1989 = vmatprep.subr.bf16.mxu1 %v2318_v1  ;;  %v2219_v32 = vld [vmem:[%s2848_s1 + $0x150] sm:$0xff]   ;;  %v2220_v33 = vld [vmem:[%s2848_s1 + $0xd8] sm:$0xff]   ;;  %v2222_v35 = vld [vmem:[%s2848_s1 + $0xe0] sm:$0xff]   ;;  %v23_v52 = vshrl.u32 %v22_v51, 7  ;;  %s1514_s28 = sshll.u32 %s2320_s27, 4  ;;  %s1515_s28 = int_to_ptr.vmem [resolvable:$true] %s1514_s28 }
  0x46   :  { %2009 = vmatprep.subr.bf16.mxu0 %v2318_v1  ;;  %v2221_v34 = vld [vmem:[%s2848_s1 + $0x158] sm:$0xff]   ;;  %v2223_v36 = vld [vmem:[%s2848_s1 + $0x160] sm:$0xff]   ;;  %v2224_v37 = vld [vmem:[%s2848_s1 + $0xe8] sm:$0xff]   ;;  %s2294_s29 = scalar_lea.vmem %s1515_s28, 32  ;;  %p2299_p1 = scmp.lt.s32.totalorder %s1515_s28, %s1515_s28 }
  0x47   :  { %v2225_v38 = vld [vmem:[%s2848_s1 + $0x168] sm:$0xff]   ;;  %v2226_v39 = vld [vmem:[%s2848_s1 + $0xf0] sm:$0xff]   ;;  %v2228_v41 = vld [vmem:[%s2848_s1 + $0xf8] sm:$0xff]   ;;  %v28_v53 = vand.u32 3, %v23_v52  ;;  %p2295_p0 = scmp.ne.s32.totalorder %s1515_s28, %s2294_s29  ;;  %p2300_p2 = scmp.lt.s32.totalorder %s2294_s29, %s2294_s29 }
  0x48   :  { %1990 = vmatpush3.bf16.msra.mxu1 %v2216_v29  ;;  %v2227_v40 = vld [vmem:[%s2848_s1 + $0x170] sm:$0xff]   ;;  %v2229_v42 = vld [vmem:[%s2848_s1 + $0x178] sm:$0xff]   ;;  %v1578_v63 = vld [vmem:[%s2849_s2] ss:$0 sm:$0xff] }
  0x49   :  { %2010 = vmatpush3.bf16.msra.mxu0 %v2217_v30  ;;  %1991 = vmatprep.subr.bf16.mxu1 %v2318_v1  ;;  %vm2526_vm1 = vcmp.eq.s32.totalorder %v28_v53, 3  ;;  %vm2530_vm2 = vcmp.eq.s32.totalorder %v28_v53, 0  ;;  %v2230_v6 = vld [vmem:[%s2848_s1 + $0x100] sm:$0xff]   ;;  %v2231_v8 = vld [vmem:[%s2848_s1 + $0x108] sm:$0xff]   ;;  %v2232_v9 = vld [vmem:[%s2848_s1 + $0x110] sm:$0xff]   ;;  %p2301_p3 = por %p2300_p2, %p2299_p1 }
  0x4a   :  { %2011 = vmatprep.subr.bf16.mxu0 %v2318_v1  ;;  %v2233_v10 = vld [vmem:[%s2848_s1 + $0x118] sm:$0xff]   ;;  %v2234_v11 = vld [vmem:[%s2848_s1 + $0x120] sm:$0xff]   ;;  %v2235_v12 = vld [vmem:[%s2848_s1 + $0x128] sm:$0xff]  }
  0x4b   :  { %v2236_v13 = vld [vmem:[%s2848_s1 + $0x130] sm:$0xff]   ;;  %v2237_v14 = vld [vmem:[%s2848_s1 + $0x138] sm:$0xff]   ;;  %v2238_v15 = vld [vmem:[%s2848_s1 + $0x180] sm:$0xff]   ;;  %p2302_p4 = pnand %p2301_p3, %p2295_p0 }
  0x4c   :  { %1992 = vmatpush3.bf16.msra.mxu1 %v2218_v31  ;;  %v2239_v16 = vld [vmem:[%s2848_s1 + $0x200] sm:$0xff]   ;;  %v2240_v17 = vld [vmem:[%s2848_s1 + $0x188] sm:$0xff]   ;;  %v2242_v19 = vld [vmem:[%s2848_s1 + $0x190] sm:$0xff]  }
  0x4d   :  { %2012 = vmatpush3.bf16.msra.mxu0 %v2219_v32  ;;  %1993 = vmatprep.subr.bf16.mxu1 %v2318_v1  ;;  %v2241_v18 = vld [vmem:[%s2848_s1 + $0x208] sm:$0xff]   ;;  %v2243_v20 = vld [vmem:[%s2848_s1 + $0x210] sm:$0xff]   ;;  %v2244_v21 = vld [vmem:[%s2848_s1 + $0x198] sm:$0xff]  }
  0x4e   :  { %2013 = vmatprep.subr.bf16.mxu0 %v2318_v1  ;;  %v2245_v22 = vld [vmem:[%s2848_s1 + $0x218] sm:$0xff]   ;;  %v2246_v23 = vld [vmem:[%s2848_s1 + $0x1a0] sm:$0xff]   ;;  %v2248_v25 = vld [vmem:[%s2848_s1 + $0x1a8] sm:$0xff]  }
  0x4f   :  { %v2247_v24 = vld [vmem:[%s2848_s1 + $0x220] sm:$0xff]   ;;  %v2249_v26 = vld [vmem:[%s2848_s1 + $0x228] sm:$0xff]   ;;  %v2250_v27 = vld [vmem:[%s2848_s1 + $0x1b0] sm:$0xff]  }
  0x50   :  { %1994 = vmatpush3.bf16.msra.mxu1 %v2220_v33  ;;  %v2251_v28 = vld [vmem:[%s2848_s1 + $0x230] sm:$0xff]   ;;  %v2252_v29 = vld [vmem:[%s2848_s1 + $0x1b8] sm:$0xff]   ;;  %v2254_v52 = vld [vmem:[%s2848_s1 + $0x1c0] sm:$0xff]  }
  0x51   :  { %2014 = vmatpush3.bf16.msra.mxu0 %v2221_v34  ;;  %1995 = vmatprep.subr.bf16.mxu1 %v2318_v1  ;;  %v2253_v30 = vld [vmem:[%s2848_s1 + $0x238] sm:$0xff]  }
  0x52   :  { %2015 = vmatprep.subr.bf16.mxu0 %v2318_v1 }
  0x54   :  { %1996 = vmatpush3.bf16.msra.mxu1 %v2222_v35 }
  0x55   :  { %2016 = vmatpush3.bf16.msra.mxu0 %v2223_v36  ;;  %1997 = vmatprep.subr.bf16.mxu1 %v2318_v1 }
  0x56   :  { %2017 = vmatprep.subr.bf16.mxu0 %v2318_v1 }
  0x58   :  { %1998 = vmatpush3.bf16.msra.mxu1 %v2224_v37 }
  0x59   :  { %1999 = vmatprep.subr.bf16.mxu1 %v2318_v1  ;;  %2018 = vmatpush3.bf16.msra.mxu0 %v2225_v38 }
  0x5a   :  { %2019 = vmatprep.subr.bf16.mxu0 %v2318_v1 }
  0x5c   :  { %2000 = vmatpush3.bf16.msra.mxu1 %v2226_v39 }
  0x5d   :  { %2020 = vmatpush3.bf16.msra.mxu0 %v2227_v40  ;;  %2001 = vmatprep.subr.bf16.mxu1 %v2318_v1 }
  0x5e   :  { %2021 = vmatprep.subr.bf16.mxu0 %v2318_v1 }
  0x60   :  { %2002 = vmatpush3.bf16.msra.mxu1 %v2228_v41 }
  0x61   :  { %2022 = vmatpush3.bf16.msra.mxu0 %v2229_v42  ;;  %2027 = vmatprep.subr.bf16.mxu1 %v2318_v1 }
  0x62   :  { %2047 = vmatprep.subr.bf16.mxu0 %v2318_v1 }
  0xf4   :  { %v138_v43 = vpop.f32.mrb[0].mxu0 }
  0xf5   :  { %v1945_v44 = vpop.f32.mrb[1].mxu0  ;;  %v266_v54 = vrot.slane %v138_v43, 7 }
  0xf6   :  { %v141_v45 = vpop.f32.mrb[2].mxu0  ;;  %v260_v47 = vpop.f32.mrb[0].mxu1 }
  0xf7   :  { %v1946_v46 = vpop.f32.mrb[3].mxu0  ;;  %v1965_v48 = vpop.f32.mrb[1].mxu1  ;;  %v267_v55 = vrot.slane %v260_v47, 1  ;;  %v270_v59 = vsel %vm2530_vm2, 0.0, %v266_v54  ;;  %v2255_v54 = vld [vmem:[%s2848_s1 + $0x1c8] sm:$0xff]  }
  0xf8   :  { %v263_v49 = vpop.f32.mrb[2].mxu1  ;;  %v1652_v46 = vld [vmem:[%s2849_s2 + $0x1] ss:$0 sm:$0xff] }
  0xf9   :  { %v1966_v50 = vpop.f32.mrb[3].mxu1  ;;  %v361_v58 = vsel %vm2526_vm1, 0.0, %v267_v55  ;;  %v2256_v55 = vld [vmem:[%s2848_s1 + $0x1d0] sm:$0xff]  }
 0x114   :  { %v353_v60 = vpop.f32.mrb[4].mxu0 }
 0x115   :  { %v354_v61 = vadd.f32 %v353_v60, %v270_v59  ;;  %v1985_v62 = vpop.f32.mrb[5].mxu0  ;;  %v2258_v59 = vld [vmem:[%s2848_s1 + $0x1e0] sm:$0xff]   ;;  %v2259_v60 = vld [vmem:[%s2848_s1 + $0x1e8] sm:$0xff]  }
 0x116   :  { %v356_v0 = vpop.f32.mrb[6].mxu0  ;;  %v2261_v62 = vld [vmem:[%s2848_s1 + $0x1f8] sm:$0xff]  }
 0x117   :  { %v362_v2 = vadd.f32 %v361_v58, %v354_v61  ;;  %v1986_v3 = vpop.f32.mrb[7].mxu0  ;;  %v2257_v58 = vld [vmem:[%s2848_s1 + $0x1d8] sm:$0xff]   ;;  %v2260_v61 = vld [vmem:[%s2848_s1 + $0x1f0] sm:$0xff]   ;;  %v2263_v0 = vld [vmem:[%s2848_s1 + $0x2c0] sm:$0xff]  }
 0x118   :  { %v2265_v3 = vld [vmem:[%s2848_s1 + $0x2c8] sm:$0xff]  }
 0x119   :  { %v370_v4 = vadd.f32 %v1578_v63, %v362_v2  ;;  %v2262_v63 = vld [vmem:[%s2848_s1 + $0x240] sm:$0xff]   ;;  %v2264_v2 = vld [vmem:[%s2848_s1 + $0x248] sm:$0xff]  }
 0x11b   :  { %v371_v5 = vmax.f32 %v370_v4, 0.0  ;;  %v2266_v4 = vld [vmem:[%s2848_s1 + $0x250] sm:$0xff]  }
 0x11d   :  { %v372_v7 = vpack.c.bf16 %v371_v5, %v371_v5  ;;  %v2267_v5 = vld [vmem:[%s2848_s1 + $0x2d0] sm:$0xff]  }
 0x11f   :  { %2004 = vmatmul.mubr.bf16.vlgmr.msra.gmra.mrb[4].mxu1 %v372_v7  ;;  %2024 = vmatmul.mubr.bf16.vlgmr.msra.gmra.mrb[8].mxu0 %v372_v7 }
 0x120   :  { %2028 = vmatpush3.bf16.msra.mxu1 %v2230_v6  ;;  %2043 = vmatprep.mubr.msk.bf16.mxu1 %vm2319_vm0, %v2318_v1  ;;  %v2268_v6 = vld [vmem:[%s2848_s1 + $0x258] sm:$0xff]  }
 0x121   :  { %2029 = vmatprep.subr.bf16.mxu1 %v2318_v1  ;;  %2063 = vmatprep.mubr.msk.bf16.mxu0 %vm2319_vm0, %v2318_v1 }
 0x122   :  { %2048 = vmatpush3.bf16.msra.mxu0 %v2238_v15  ;;  %v2277_v15 = vld [vmem:[%s2848_s1 + $0x2f8] sm:$0xff]  }
 0x123   :  { %2049 = vmatprep.subr.bf16.mxu0 %v2318_v1 }
 0x124   :  { %2030 = vmatpush3.bf16.msra.mxu1 %v2231_v8  ;;  %v2270_v8 = vld [vmem:[%s2848_s1 + $0x260] sm:$0xff]  }
 0x125   :  { %2031 = vmatprep.subr.bf16.mxu1 %v2318_v1 }
 0x126   :  { %2050 = vmatpush3.bf16.msra.mxu0 %v2240_v17 }
 0x127   :  { %2051 = vmatprep.subr.bf16.mxu0 %v2318_v1 }
 0x128   :  { %2032 = vmatpush3.bf16.msra.mxu1 %v2232_v9  ;;  %v2271_v9 = vld [vmem:[%s2848_s1 + $0x2e0] sm:$0xff]  }
 0x129   :  { %2033 = vmatprep.subr.bf16.mxu1 %v2318_v1 }
 0x12a   :  { %2052 = vmatpush3.bf16.msra.mxu0 %v2242_v19 }
 0x12b   :  { %2053 = vmatprep.subr.bf16.mxu0 %v2318_v1 }
 0x12c   :  { %2034 = vmatpush3.bf16.msra.mxu1 %v2233_v10  ;;  %v2272_v10 = vld [vmem:[%s2848_s1 + $0x268] sm:$0xff]  }
 0x12d   :  { %2035 = vmatprep.subr.bf16.mxu1 %v2318_v1 }
 0x12e   :  { %2054 = vmatpush3.bf16.msra.mxu0 %v2244_v21 }
 0x12f   :  { %2055 = vmatprep.subr.bf16.mxu0 %v2318_v1 }
 0x130   :  { %2036 = vmatpush3.bf16.msra.mxu1 %v2234_v11  ;;  %v2273_v11 = vld [vmem:[%s2848_s1 + $0x2e8] sm:$0xff]  }
 0x131   :  { %2037 = vmatprep.subr.bf16.mxu1 %v2318_v1 }
 0x132   :  { %2056 = vmatpush3.bf16.msra.mxu0 %v2246_v23 }
 0x133   :  { %2057 = vmatprep.subr.bf16.mxu0 %v2318_v1 }
 0x134   :  { %2038 = vmatpush3.bf16.msra.mxu1 %v2235_v12  ;;  %v2274_v12 = vld [vmem:[%s2848_s1 + $0x270] sm:$0xff]  }
 0x135   :  { %2039 = vmatprep.subr.bf16.mxu1 %v2318_v1 }
 0x136   :  { %2058 = vmatpush3.bf16.msra.mxu0 %v2248_v25 }
 0x137   :  { %2059 = vmatprep.subr.bf16.mxu0 %v2318_v1 }
 0x138   :  { %2040 = vmatpush3.bf16.msra.mxu1 %v2236_v13  ;;  %v2275_v13 = vld [vmem:[%s2848_s1 + $0x2f0] sm:$0xff]  }
 0x139   :  { %2041 = vmatprep.subr.bf16.mxu1 %v2318_v1 }
 0x13a   :  { %2060 = vmatpush3.bf16.msra.mxu0 %v2250_v27 }
 0x13b   :  { %2061 = vmatprep.subr.bf16.mxu0 %v2318_v1 }
 0x13c   :  { %2042 = vmatpush3.bf16.msra.mxu1 %v2237_v14  ;;  %v2276_v14 = vld [vmem:[%s2848_s1 + $0x278] sm:$0xff]  }
 0x13d   :  { %2067 = vmatprep.subr.bf16.mxu1 %v2318_v1 }
 0x13e   :  { %2062 = vmatpush3.bf16.msra.mxu0 %v2252_v29 }
 0x13f   :  { %2044 = vmatmul.mubr.bf16.vlgmr.msra.gmra.mrb[8].mxu1 %v372_v7  ;;  %2087 = vmatprep.subr.bf16.mxu0 %v2318_v1  ;;  %v2269_v7 = vld [vmem:[%s2848_s1 + $0x2d8] sm:$0xff]  }
 0x140   :  { %2083 = vmatprep.mubr.msk.bf16.mxu1 %vm2319_vm0, %v2318_v1  ;;  %2068 = vmatpush3.bf16.msra.mxu1 %v2239_v16 }
 0x141   :  { %2069 = vmatprep.subr.bf16.mxu1 %v2318_v1 }
 0x144   :  { %2070 = vmatpush3.bf16.msra.mxu1 %v2241_v18 }
 0x145   :  { %2071 = vmatprep.subr.bf16.mxu1 %v2318_v1 }
 0x148   :  { %2072 = vmatpush3.bf16.msra.mxu1 %v2243_v20 }
 0x149   :  { %2073 = vmatprep.subr.bf16.mxu1 %v2318_v1 }
 0x14c   :  { %2074 = vmatpush3.bf16.msra.mxu1 %v2245_v22 }
 0x14d   :  { %2075 = vmatprep.subr.bf16.mxu1 %v2318_v1 }
 0x150   :  { %2076 = vmatpush3.bf16.msra.mxu1 %v2247_v24 }
 0x151   :  { %2077 = vmatprep.subr.bf16.mxu1 %v2318_v1 }
 0x154   :  { %2078 = vmatpush3.bf16.msra.mxu1 %v2249_v26 }
 0x155   :  { %2079 = vmatprep.subr.bf16.mxu1 %v2318_v1 }
 0x158   :  { %2080 = vmatpush3.bf16.msra.mxu1 %v2251_v28 }
 0x159   :  { %2081 = vmatprep.subr.bf16.mxu1 %v2318_v1 }
 0x15c   :  { %2082 = vmatpush3.bf16.msra.mxu1 %v2253_v30 }
 0x15d   :  { %2107 = vmatprep.subr.bf16.mxu1 %v2318_v1 }
 0x1f2   :  { %v472_v31 = vpop.f32.mrb[4].mxu1  ;;  %v594_v32 = vpop.f32.mrb[8].mxu0 }
 0x1f3   :  { %v2005_v33 = vpop.f32.mrb[5].mxu1  ;;  %v2025_v34 = vpop.f32.mrb[9].mxu0  ;;  %v600_v39 = vrot.slane %v472_v31, 7  ;;  %v601_v40 = vrot.slane %v594_v32, 1  ;;  %v1726_v31 = vld [vmem:[%s2849_s2 + $0x2] ss:$0 sm:$0xff] }
 0x1f4   :  { %v475_v35 = vpop.f32.mrb[6].mxu1  ;;  %v597_v36 = vpop.f32.mrb[10].mxu0 }
 0x1f5   :  { %v2006_v37 = vpop.f32.mrb[7].mxu1  ;;  %v2026_v38 = vpop.f32.mrb[11].mxu0  ;;  %v602_v41 = vsel %vm2530_vm2, 0.0, %v600_v39  ;;  %v691_v45 = vsel %vm2526_vm1, 0.0, %v601_v40  ;;  %v2279_v39 = vld [vmem:[%s2848_s1 + $0x288] sm:$0xff]   ;;  %v2280_v40 = vld [vmem:[%s2848_s1 + $0x290] sm:$0xff]  }
 0x1f6   :  { %v2278_v37 = vld [vmem:[%s2848_s1 + $0x280] sm:$0xff]  }
 0x212   :  { %v685_v42 = vpop.f32.mrb[8].mxu1 }
 0x213   :  { %v686_v43 = vadd.f32 %v685_v42, %v602_v41  ;;  %v2045_v44 = vpop.f32.mrb[9].mxu1  ;;  %v2281_v41 = vld [vmem:[%s2848_s1 + $0x298] sm:$0xff]   ;;  %v2282_v42 = vld [vmem:[%s2848_s1 + $0x2a0] sm:$0xff]  }
 0x214   :  { %v688_v47 = vpop.f32.mrb[10].mxu1  ;;  %v2284_v44 = vld [vmem:[%s2848_s1 + $0x2b0] sm:$0xff]  }
 0x215   :  { %v692_v48 = vadd.f32 %v691_v45, %v686_v43  ;;  %v2046_v49 = vpop.f32.mrb[11].mxu1  ;;  %v2283_v43 = vld [vmem:[%s2848_s1 + $0x2a8] sm:$0xff]   ;;  %v2285_v45 = vld [vmem:[%s2848_s1 + $0x2b8] sm:$0xff]  }
 0x216   :  { %v2287_v47 = vld [vmem:[%s2850_s3 + $0x8] sm:$0xff]   ;;  %v2289_v49 = vld [vmem:[%s2850_s3 + $0x18] sm:$0xff]  }
 0x217   :  { %v701_v50 = vadd.f32 %v1652_v46, %v692_v48  ;;  %v2286_v46 = vld [vmem:[%s2850_s3] sm:$0xff]   ;;  %v2288_v48 = vld [vmem:[%s2850_s3 + $0x10] sm:$0xff]  }
 0x219   :  { %v702_v51 = vmax.f32 %v701_v50, 0.0  ;;  %v2290_v50 = vld [vmem:[%s2850_s3 + $0x20] sm:$0xff]  }
 0x21b   :  { %v703_v53 = vpack.c.bf16 %v702_v51, %v702_v51  ;;  %v2291_v51 = vld [vmem:[%s2850_s3 + $0x28] sm:$0xff]  }
 0x21d   :  { %2064 = vmatmul.mubr.bf16.vlgmr.msra.gmra.mrb[12].mxu0 %v703_v53  ;;  %2084 = vmatmul.mubr.bf16.vlgmr.msra.gmra.mrb[12].mxu1 %v703_v53 }
 0x21e   :  { %2088 = vmatpush3.bf16.msra.mxu0 %v2254_v52  ;;  %2103 = vmatprep.mubr.msk.bf16.mxu0 %vm2319_vm0, %v2318_v1  ;;  %v2292_v52 = vld [vmem:[%s2850_s3 + $0x30] sm:$0xff]  }
 0x21f   :  { %2089 = vmatprep.subr.bf16.mxu0 %v2318_v1  ;;  %2123 = vmatprep.mubr.msk.bf16.mxu1 %vm2319_vm0, %v2318_v1 }
 0x220   :  { %2108 = vmatpush3.bf16.msra.mxu1 %v2262_v63 }
 0x221   :  { %2109 = vmatprep.subr.bf16.mxu1 %v2318_v1 }
 0x222   :  { %2090 = vmatpush3.bf16.msra.mxu0 %v2255_v54 }
 0x223   :  { %2091 = vmatprep.subr.bf16.mxu0 %v2318_v1 }
 0x224   :  { %2110 = vmatpush3.bf16.msra.mxu1 %v2264_v2 }
 0x225   :  { %2111 = vmatprep.subr.bf16.mxu1 %v2318_v1 }
 0x226   :  { %2092 = vmatpush3.bf16.msra.mxu0 %v2256_v55 }
 0x227   :  { %2093 = vmatprep.subr.bf16.mxu0 %v2318_v1 }
 0x228   :  { %2112 = vmatpush3.bf16.msra.mxu1 %v2266_v4 }
 0x229   :  { %2113 = vmatprep.subr.bf16.mxu1 %v2318_v1 }
 0x22a   :  { %2094 = vmatpush3.bf16.msra.mxu0 %v2257_v58 }
 0x22b   :  { %2095 = vmatprep.subr.bf16.mxu0 %v2318_v1 }
 0x22c   :  { %2114 = vmatpush3.bf16.msra.mxu1 %v2268_v6 }
 0x22d   :  { %2115 = vmatprep.subr.bf16.mxu1 %v2318_v1 }
 0x22e   :  { %2096 = vmatpush3.bf16.msra.mxu0 %v2258_v59 }
 0x22f   :  { %2097 = vmatprep.subr.bf16.mxu0 %v2318_v1 }
 0x230   :  { %2116 = vmatpush3.bf16.msra.mxu1 %v2270_v8 }
 0x231   :  { %2117 = vmatprep.subr.bf16.mxu1 %v2318_v1 }
 0x232   :  { %2098 = vmatpush3.bf16.msra.mxu0 %v2259_v60 }
 0x233   :  { %2099 = vmatprep.subr.bf16.mxu0 %v2318_v1 }
 0x234   :  { %2118 = vmatpush3.bf16.msra.mxu1 %v2272_v10 }
 0x235   :  { %2119 = vmatprep.subr.bf16.mxu1 %v2318_v1 }
 0x236   :  { %2100 = vmatpush3.bf16.msra.mxu0 %v2260_v61 }
 0x237   :  { %2101 = vmatprep.subr.bf16.mxu0 %v2318_v1 }
 0x238   :  { %2120 = vmatpush3.bf16.msra.mxu1 %v2274_v12 }
 0x239   :  { %2121 = vmatprep.subr.bf16.mxu1 %v2318_v1 }
 0x23a   :  { %2102 = vmatpush3.bf16.msra.mxu0 %v2261_v62 }
 0x23b   :  { %2127 = vmatprep.subr.bf16.mxu0 %v2318_v1 }
 0x23c   :  { %2122 = vmatpush3.bf16.msra.mxu1 %v2276_v14 }
 0x23d   :  { %2104 = vmatmul.mubr.bf16.vlgmr.msra.gmra.mrb[16].mxu0 %v703_v53  ;;  %2147 = vmatprep.subr.bf16.mxu1 %v2318_v1  ;;  %v2293_v53 = vld [vmem:[%s2850_s3 + $0x38] sm:$0xff]  }
 0x23e   :  { %2143 = vmatprep.mubr.msk.bf16.mxu0 %vm2319_vm0, %v2318_v1  ;;  %2128 = vmatpush3.bf16.msra.mxu0 %v2263_v0 }
 0x23f   :  { %2129 = vmatprep.subr.bf16.mxu0 %v2318_v1 }
 0x242   :  { %2130 = vmatpush3.bf16.msra.mxu0 %v2265_v3 }
 0x243   :  { %2131 = vmatprep.subr.bf16.mxu0 %v2318_v1 }
 0x246   :  { %2132 = vmatpush3.bf16.msra.mxu0 %v2267_v5 }
 0x247   :  { %2133 = vmatprep.subr.bf16.mxu0 %v2318_v1 }
 0x24a   :  { %2134 = vmatpush3.bf16.msra.mxu0 %v2269_v7  ;;  %v1800_v7 = vld [vmem:[%s2849_s2 + $0x3] ss:$0 sm:$0xff] }
 0x24b   :  { %2135 = vmatprep.subr.bf16.mxu0 %v2318_v1 }
 0x24e   :  { %2136 = vmatpush3.bf16.msra.mxu0 %v2271_v9 }
 0x24f   :  { %2137 = vmatprep.subr.bf16.mxu0 %v2318_v1 }
 0x252   :  { %2138 = vmatpush3.bf16.msra.mxu0 %v2273_v11 }
 0x253   :  { %2139 = vmatprep.subr.bf16.mxu0 %v2318_v1 }
 0x256   :  { %2140 = vmatpush3.bf16.msra.mxu0 %v2275_v13 }
 0x257   :  { %2141 = vmatprep.subr.bf16.mxu0 %v2318_v1 }
 0x25a   :  { %2142 = vmatpush3.bf16.msra.mxu0 %v2277_v15 }
 0x25b   :  { %2167 = vmatprep.subr.bf16.mxu0 %v2318_v1 }
 0x2f0   :  { %v803_v16 = vpop.f32.mrb[12].mxu0  ;;  %v925_v17 = vpop.f32.mrb[12].mxu1 }
 0x2f1   :  { %v2065_v18 = vpop.f32.mrb[13].mxu0  ;;  %v2085_v19 = vpop.f32.mrb[13].mxu1  ;;  %v931_v24 = vrot.slane %v803_v16, 7  ;;  %v932_v25 = vrot.slane %v925_v17, 1 }
 0x2f2   :  { %v806_v20 = vpop.f32.mrb[14].mxu0  ;;  %v928_v21 = vpop.f32.mrb[14].mxu1 }
 0x2f3   :  { %v2066_v22 = vpop.f32.mrb[15].mxu0  ;;  %v2086_v23 = vpop.f32.mrb[15].mxu1  ;;  %v933_v26 = vsel %vm2530_vm2, 0.0, %v931_v24  ;;  %v1022_v30 = vsel %vm2526_vm1, 0.0, %v932_v25 }
 0x310   :  { %v1016_v27 = vpop.f32.mrb[16].mxu0 }
 0x311   :  { %v1017_v28 = vadd.f32 %v1016_v27, %v933_v26  ;;  %v2105_v29 = vpop.f32.mrb[17].mxu0 }
 0x312   :  { %v1019_v32 = vpop.f32.mrb[18].mxu0 }
 0x313   :  { %v1023_v33 = vadd.f32 %v1022_v30, %v1017_v28  ;;  %v2106_v34 = vpop.f32.mrb[19].mxu0 }
 0x314   :  { %v1801_v34 = vld [vmem:[%s2851_s4] ss:$0 sm:$0xff] }
 0x315   :  { %v1032_v35 = vadd.f32 %v1726_v31, %v1023_v33 }
 0x317   :  { %v1033_v36 = vmax.f32 %v1032_v35, 0.0 }
 0x319   :  { %v1034_v38 = vpack.c.bf16 %v1033_v36, %v1033_v36 }
 0x31b   :  { %2124 = vmatmul.mubr.bf16.vlgmr.msra.gmra.mrb[16].mxu1 %v1034_v38  ;;  %2144 = vmatmul.mubr.bf16.vlgmr.msra.gmra.mrb[20].mxu0 %v1034_v38 }
 0x31c   :  { %2148 = vmatpush3.bf16.msra.mxu1 %v2278_v37  ;;  %2163 = vmatprep.mubr.msk.bf16.mxu1 %vm2319_vm0, %v2318_v1 }
 0x31d   :  { %2149 = vmatprep.subr.bf16.mxu1 %v2318_v1  ;;  %2183 = vmatprep.mubr.msk.bf16.mxu0 %vm2319_vm0, %v2318_v1 }
 0x31e   :  { %2168 = vmatpush3.bf16.msra.mxu0 %v2286_v46 }
 0x31f   :  { %2169 = vmatprep.subr.bf16.mxu0 %v2318_v1 }
 0x320   :  { %2150 = vmatpush3.bf16.msra.mxu1 %v2279_v39 }
 0x321   :  { %2151 = vmatprep.subr.bf16.mxu1 %v2318_v1 }
 0x322   :  { %2170 = vmatpush3.bf16.msra.mxu0 %v2287_v47 }
 0x323   :  { %2171 = vmatprep.subr.bf16.mxu0 %v2318_v1 }
 0x324   :  { %2152 = vmatpush3.bf16.msra.mxu1 %v2280_v40 }
 0x325   :  { %2153 = vmatprep.subr.bf16.mxu1 %v2318_v1 }
 0x326   :  { %2172 = vmatpush3.bf16.msra.mxu0 %v2288_v48 }
 0x327   :  { %2173 = vmatprep.subr.bf16.mxu0 %v2318_v1 }
 0x328   :  { %2154 = vmatpush3.bf16.msra.mxu1 %v2281_v41 }
 0x329   :  { %2155 = vmatprep.subr.bf16.mxu1 %v2318_v1 }
 0x32a   :  { %2174 = vmatpush3.bf16.msra.mxu0 %v2289_v49 }
 0x32b   :  { %2175 = vmatprep.subr.bf16.mxu0 %v2318_v1 }
 0x32c   :  { %2156 = vmatpush3.bf16.msra.mxu1 %v2282_v42 }
 0x32d   :  { %2157 = vmatprep.subr.bf16.mxu1 %v2318_v1 }
 0x32e   :  { %2176 = vmatpush3.bf16.msra.mxu0 %v2290_v50 }
 0x32f   :  { %2177 = vmatprep.subr.bf16.mxu0 %v2318_v1 }
 0x330   :  { %2158 = vmatpush3.bf16.msra.mxu1 %v2283_v43 }
 0x331   :  { %2159 = vmatprep.subr.bf16.mxu1 %v2318_v1 }
 0x332   :  { %2178 = vmatpush3.bf16.msra.mxu0 %v2291_v51 }
 0x333   :  { %2179 = vmatprep.subr.bf16.mxu0 %v2318_v1 }
 0x334   :  { %2160 = vmatpush3.bf16.msra.mxu1 %v2284_v44 }
 0x335   :  { %2161 = vmatprep.subr.bf16.mxu1 %v2318_v1 }
 0x336   :  { %2180 = vmatpush3.bf16.msra.mxu0 %v2292_v52 }
 0x337   :  { %2181 = vmatprep.subr.bf16.mxu0 %v2318_v1 }
 0x338   :  { %2162 = vmatpush3.bf16.msra.mxu1 %v2285_v45 }
 0x33a   :  { %2182 = vmatpush3.bf16.msra.mxu0 %v2293_v53 }
 0x33b   :  { %2164 = vmatmul.mubr.bf16.vlgmr.msra.gmra.mrb[20].mxu1 %v1034_v38 }
 0x3ee   :  { %v1134_v54 = vpop.f32.mrb[16].mxu1  ;;  %v1256_v55 = vpop.f32.mrb[20].mxu0 }
 0x3ef   :  { %v2125_v58 = vpop.f32.mrb[17].mxu1  ;;  %v2145_v59 = vpop.f32.mrb[21].mxu0  ;;  %v1262_v0 = vrot.slane %v1134_v54, 7  ;;  %v1263_v2 = vrot.slane %v1256_v55, 1 }
 0x3f0   :  { %v1137_v60 = vpop.f32.mrb[18].mxu1  ;;  %v1259_v61 = vpop.f32.mrb[22].mxu0 }
 0x3f1   :  { %v2126_v62 = vpop.f32.mrb[19].mxu1  ;;  %v2146_v63 = vpop.f32.mrb[23].mxu0  ;;  %v1264_v3 = vsel %vm2530_vm2, 0.0, %v1262_v0  ;;  %v1353_v1 = vsel %vm2526_vm1, 0.0, %v1263_v2 }
 0x40e   :  { %v1347_v4 = vpop.f32.mrb[20].mxu1 }
 0x40f   :  { %v1348_v5 = vadd.f32 %v1347_v4, %v1264_v3  ;;  %v2165_v6 = vpop.f32.mrb[21].mxu1 }
 0x410   :  { %v1350_v8 = vpop.f32.mrb[22].mxu1 }
 0x411   :  { %v1354_v9 = vadd.f32 %v1353_v1, %v1348_v5  ;;  %v2166_v10 = vpop.f32.mrb[23].mxu1 }
 0x413   :  { %v1363_v11 = vadd.f32 %v1800_v7, %v1354_v9 }
 0x415   :  { %v1364_v12 = vmax.f32 %v1363_v11, 0.0 }
 0x417   :  { %v1366_v13 = vcombine.high %v1364_v12, %v1364_v12  ;;  %v1369_v14 = vsel %vm1368_vm3, %v1364_v12, 0.0 }
 0x418   :  { %v1370_v57 = vrot.slane %v1369_v14, 4 }
 0x419   :  { %v1376_v15 = vsel %vm1368_vm3, %v1366_v13, 0.0 }
 0x41a   :  { %v1371_v16 = vadd.f32 %v1370_v57, %v1369_v14  ;;  %v1377_v17 = vrot.slane %v1376_v15, 4 }
 0x41c   :  { %v1372_v18 = vrot.slane %v1371_v16, 2  ;;  %v1378_v19 = vadd.f32 %v1377_v17, %v1376_v15 }
 0x41e   :  { %v1373_v56 = vadd.f32 %v1372_v18, %v1371_v16  ;;  %v1379_v20 = vrot.slane %v1378_v19, 2 }
 0x420   :  { %v1374_v21 = vrot.slane %v1373_v56, 1  ;;  %v1380_v22 = vadd.f32 %v1379_v20, %v1378_v19 }
 0x422   :  { %v1375_v23 = vadd.f32 %v1374_v21, %v1373_v56  ;;  %v1381_v24 = vrot.slane %v1380_v22, 1 }
 0x424   :  { %v1384_v25 = vmul.f32 0.25, %v1375_v23  ;;  %v1382_v26 = vadd.f32 %v1381_v24, %v1380_v22 }
 0x426   :  { %v1385_v27 = vmul.f32 0.25, %v1382_v26  ;;  %v1386_v28 = vpack.c.bf16 %v1384_v25, %v1384_v25 }
 0x428   :  { %v1387_v29 = vpack.c.bf16 %v1385_v27, %v1385_v27  ;;  %v1413_v30 = vunpack.c.l.b16 %v1386_v28 }
 0x42a   :  { %v1414_v31 = vunpack.c.l.b16 %v1387_v29 }
 0x42c   :  { %v1416_v32 = vsel %vm1415_vm4, %v1414_v31, %v1413_v30 }
 0x42d   :  { %v1417_v33 = vpack.c.b16 %v1416_v32, %v1416_v32 }
 0x42f   :  { %2184 = vmatmul.mubr.bf16.vlgmr.msra.gmra.mrb[24].mxu0 %v1417_v33 }
 0x502   :  { %v1501_v35 = vpop.f32.mrb[24].mxu0 }
 0x503   :  { %v1502_v36 = vadd.f32 %v1801_v34, %v1501_v35  ;;  %v2185_v37 = vpop.f32.mrb[25].mxu0 }
 0x504   :  { %v1504_v38 = vpop.f32.mrb[26].mxu0 }
 0x505   :  { %1507 = vst [vmem:[#allocation2] sm:$0x3] %v1502_v36  ;;  %v2186_v39 = vpop.f32.mrb[27].mxu0 }
 0x506   :  { %2305 = shalt.err (!%p2302_p4)
}
 0x507   :  { %s2306_s4 = scalar_lea.hbm %s2852_s5, 32 }
 0x508   :  { %p2307_p5 = scmp.ne.s32.totalorder %s2852_s5, %s2306_s4  ;;  %p2310_p6 = scmp.lt.u32.totalorder %s2306_s4, %s2852_s5 }
 0x50a   :  { %p2312_p7 = pnand %p2310_p6, %p2307_p5 }
 0x50c   :  { %2315 = shalt.err (!%p2312_p7)
}
 0x50d   :  { %1517 = dma.vmem_to_hbm [thread:$0]  %s1515_s28, 32, %s2852_s5, [#allocation3]  }
 0x50e   :  { %2316 = dma.done.wait [#allocation3], 32  }
 0x50f   :  { %2317 = vsyncadd [#allocation3], 4294967264 }
 0x510   :  { %1521 = vsyncpa [#allocation3], 1 }

</bundles_post_ra>
